<compile_context>
chip_gen: v7x
topology: tpu7x:2x2x1
jax: 0.10.0
libtpu: 0.0.40
codegen_flags: <defaults>
</compile_context>

<pallas_src>
import functools

import jax
import jax.numpy as jnp
from jax.experimental import pallas as pl
from jax.experimental.pallas import tpu as pltpu


def _mlp_kernel(xT_ref, w1_ref, b1_ref, w2_ref, b2_ref, w3_ref, b3_ref, o_ref):
    xT = xT_ref[...]                                   # (2, block_b) f32
    w1 = w1_ref[...]                                   # (128, 2)     f32

    # ---- Layer 1 (in=2): two VPU broadcast-FMAs, no MXU pass for K=2 ----
    h1 = (w1[:, 0:1] * xT[0:1, :]                      # (128,1)*(1,bb) -> (128,bb)
          + w1[:, 1:2] * xT[1:2, :]
          + b1_ref[...])                               # bias (128,1) broadcast over lanes
    h1 = jnp.maximum(h1, 0.0)                          # ReLU in f32 (v5e VPU has no bf16)

    # ---- Layer 2 (128x128): bf16 MXU matmul, f32 accumulate ----
    h2 = jnp.dot(w2_ref[...], h1.astype(jnp.bfloat16),
                 preferred_element_type=jnp.float32) + b2_ref[...]
    h2 = jnp.maximum(h2, 0.0)                          # (128, block_b) f32

    # ---- Layer 3 (out=1): VPU multiply + sublane reduction (XLU), no M=1 MXU pass ----
    out = jnp.sum(w3_ref[...] * h2, axis=0, keepdims=True) + b3_ref[...]   # (1, block_b)
    o_ref[...] = out.astype(o_ref.dtype)


@functools.partial(jax.jit, static_argnames=("block_b",))
def deep_network_forward(x, params, block_b=512):
    """x: (B, 2) float32.  params: PyTorch-layout weights w{1,2,3}:(out,in), b{1,2,3}:(out,)."""
    w1, b1 = params["w1"], params["b1"]        # (128, 2), (128,)
    w2, b2 = params["w2"], params["b2"]        # (128, 128), (128,)
    w3, b3 = params["w3"], params["b3"]        # (1, 128), (1,)

    B, in_dim = x.shape
    h_dim = w1.shape[0]
    out_dim = w3.shape[0]

    num_tiles = pl.cdiv(B, block_b)
    B_pad = num_tiles * block_b

    # Batch-on-lanes: (2, B_pad) input, (1, B_pad) output — both lane-dense.
    xT = jnp.pad(x, ((0, B_pad - B), (0, 0))).T        # (2, B_pad)
    b1c = b1.reshape(h_dim, 1)
    b2c = b2.reshape(h_dim, 1)
    w2_bf16 = w2.astype(jnp.bfloat16)                  # MXU-native dtype for the big matmul
    w3c = w3.reshape(h_dim, 1)                         # (128, 1) column for the VPU reduce
    b3c = b3.reshape(1, 1)

    full = lambda shape: pl.BlockSpec(shape, lambda i: (0, 0))   # resident weights/biases
    # NOTE: constant index maps -> Mosaic keeps these tiles resident; explicit
    # pipeline_mode=pl.Buffered(1) would only trim a tiny double-buffer (low priority).

    out_T = pl.pallas_call(
        _mlp_kernel,
        out_shape=jax.ShapeDtypeStruct((out_dim, B_pad), x.dtype),
        grid_spec=pltpu.PrefetchScalarGridSpec(
            num_scalar_prefetch=0,
            grid=(num_tiles,),
            in_specs=[
                pl.BlockSpec((in_dim, block_b), lambda i: (0, i)),   # x^T tile (lane-dense)
                full((h_dim, in_dim)),                               # w1 (128, 2)
                full((h_dim, 1)),                                    # b1
                full((h_dim, h_dim)),                                # w2 (bf16)
                full((h_dim, 1)),                                    # b2
                full((h_dim, 1)),                                    # w3 column
                full((1, 1)),                                        # b3
            ],
            out_specs=pl.BlockSpec((out_dim, block_b), lambda i: (0, i)),
        ),
        compiler_params=pltpu.CompilerParams(
            dimension_semantics=("parallel",),   # batch tiles shard across v7x's 2 TCs
        ),
    )(xT, w1, b1c, w2_bf16, b2c, w3c, b3c)

    return out_T[:, :B].T                              # back to (B, 1)


def init_params(key):
    """PyTorch nn.Linear default init (uniform +-1/sqrt(fan_in)), PyTorch layout (out,in)."""
    dims = [(2, 128), (128, 128), (128, 1)]            # (fan_in, fan_out)
    params = {}
    for idx, (fan_in, fan_out) in enumerate(dims, start=1):
        key, kw, kb = jax.random.split(key, 3)
        bound = 1.0 / jnp.sqrt(jnp.float32(fan_in))
        params[f"w{idx}"] = jax.random.uniform(
            kw, (fan_out, fan_in), jnp.float32, minval=-bound, maxval=bound
        )
        params[f"b{idx}"] = jax.random.uniform(
            kb, (fan_out,), jnp.float32, minval=-bound, maxval=bound
        )
    return params


def reference_forward(x, params):
    # Pure-JAX f32 reference with PyTorch semantics: y = x @ W^T + b
    h1 = jnp.maximum(x @ params["w1"].T + params["b1"], 0.0)
    h2 = jnp.maximum(h1 @ params["w2"].T + params["b2"], 0.0)
    return h2 @ params["w3"].T + params["b3"]


if __name__ == "__main__":
    key = jax.random.PRNGKey(0)
    key, kx = jax.random.split(key)
    B = 1000                      # non-multiple of block_b: exercises padding; pads to 1024 -> 2 grid steps
    x = jax.random.normal(kx, (B, 2), jnp.float32)
    params = init_params(key)

    out = deep_network_forward(x, params)
    out = jax.block_until_ready(out)

    ref = reference_forward(x, params)
    assert out.shape == (B, 1), f"bad shape {out.shape}"
    # Tolerance loosened vs the f32 reference because layer 2 runs in bf16 (f32 accumulate).
    assert jnp.allclose(out, ref, atol=3e-2, rtol=3e-2), (
        f"mismatch vs pure-JAX reference, max abs err = {jnp.max(jnp.abs(out - ref))}"
    )
    print("KERNEL_OK")
</pallas_src>

<mosaic_0001>
module attributes {stable_mosaic.version = 11 : i64} {
  func.func @_mlp_kernel(%arg0: i32, %arg1: memref<2x512xf32, #tpu.memory_space<vmem>>, %arg2: memref<128x2xf32, #tpu.memory_space<vmem>>, %arg3: memref<128x1xf32, #tpu.memory_space<vmem>>, %arg4: memref<128x128xbf16, #tpu.memory_space<vmem>>, %arg5: memref<128x1xf32, #tpu.memory_space<vmem>>, %arg6: memref<128x1xf32, #tpu.memory_space<vmem>>, %arg7: memref<1x1xf32, #tpu.memory_space<vmem>>, %arg8: memref<1x512xf32, #tpu.memory_space<vmem>>) attributes {dimension_semantics = [#tpu.dimension_semantics<parallel>], iteration_bounds = array<i64: 2>, scalar_prefetch = 0 : i64, scratch_operands = 0 : i64, tpu.core_type = #tpu.core_type<tc>, window_params = [{transform_indices = @transform_0, window_bounds = array<i64: 2, 512>}, {pipeline_mode = #tpu.pipeline_mode<synchronous>, transform_indices = @transform_1, window_bounds = array<i64: 128, 2>}, {pipeline_mode = #tpu.pipeline_mode<synchronous>, transform_indices = @transform_2, window_bounds = array<i64: 128, 1>}, {pipeline_mode = #tpu.pipeline_mode<synchronous>, transform_indices = @transform_3, window_bounds = array<i64: 128, 128>}, {pipeline_mode = #tpu.pipeline_mode<synchronous>, transform_indices = @transform_4, window_bounds = array<i64: 128, 1>}, {pipeline_mode = #tpu.pipeline_mode<synchronous>, transform_indices = @transform_5, window_bounds = array<i64: 128, 1>}, {pipeline_mode = #tpu.pipeline_mode<synchronous>, transform_indices = @transform_6, window_bounds = array<i64: 1, 1>}, {transform_indices = @transform_7, window_bounds = array<i64: 1, 512>}]} {
    %c0 = arith.constant 0 : index
    %c0_0 = arith.constant 0 : index
    %0 = vector.load %arg1[%c0, %c0_0] : memref<2x512xf32, #tpu.memory_space<vmem>>, vector<2x512xf32>
    %c0_1 = arith.constant 0 : index
    %c0_2 = arith.constant 0 : index
    %1 = vector.load %arg2[%c0_1, %c0_2] : memref<128x2xf32, #tpu.memory_space<vmem>>, vector<128x2xf32>
    %2 = vector.extract_strided_slice %1 {offsets = [0, 0], sizes = [128, 1], strides = [1, 1]} : vector<128x2xf32> to vector<128x1xf32>
    %3 = vector.extract_strided_slice %0 {offsets = [0, 0], sizes = [1, 512], strides = [1, 1]} : vector<2x512xf32> to vector<1x512xf32>
    %4 = vector.broadcast %2 : vector<128x1xf32> to vector<128x512xf32>
    %5 = vector.broadcast %3 : vector<1x512xf32> to vector<128x512xf32>
    %6 = arith.mulf %4, %5 : vector<128x512xf32>
    %7 = vector.extract_strided_slice %1 {offsets = [0, 1], sizes = [128, 1], strides = [1, 1]} : vector<128x2xf32> to vector<128x1xf32>
    %8 = vector.extract_strided_slice %0 {offsets = [1, 0], sizes = [1, 512], strides = [1, 1]} : vector<2x512xf32> to vector<1x512xf32>
    %9 = vector.broadcast %7 : vector<128x1xf32> to vector<128x512xf32>
    %10 = vector.broadcast %8 : vector<1x512xf32> to vector<128x512xf32>
    %11 = arith.mulf %9, %10 : vector<128x512xf32>
    %12 = arith.addf %6, %11 : vector<128x512xf32>
    %c0_3 = arith.constant 0 : index
    %c0_4 = arith.constant 0 : index
    %13 = vector.load %arg3[%c0_3, %c0_4] : memref<128x1xf32, #tpu.memory_space<vmem>>, vector<128x1xf32>
    %14 = vector.broadcast %13 : vector<128x1xf32> to vector<128x512xf32>
    %15 = arith.addf %12, %14 : vector<128x512xf32>
    %cst = arith.constant 0.000000e+00 : f32
    %16 = vector.broadcast %cst : f32 to vector<128x512xf32>
    %17 = arith.maximumf %15, %16 : vector<128x512xf32>
    %c0_5 = arith.constant 0 : index
    %c0_6 = arith.constant 0 : index
    %18 = vector.load %arg4[%c0_5, %c0_6] : memref<128x128xbf16, #tpu.memory_space<vmem>>, vector<128x128xbf16>
    %19 = arith.truncf %17 : vector<128x512xf32> to vector<128x512xbf16>
    %cst_7 = arith.constant dense<0.000000e+00> : vector<128x512xf32>
    %20 = tpu.matmul %18, %19, %cst_7 {dimension_numbers = #tpu.dot_dimension_numbers<[1], [0], [0], [1], [0, 0, 1, 1], [], []>} : vector<128x128xbf16>, vector<128x512xbf16>, vector<128x512xf32> -> vector<128x512xf32>
    %c0_8 = arith.constant 0 : index
    %c0_9 = arith.constant 0 : index
    %21 = vector.load %arg5[%c0_8, %c0_9] : memref<128x1xf32, #tpu.memory_space<vmem>>, vector<128x1xf32>
    %22 = vector.broadcast %21 : vector<128x1xf32> to vector<128x512xf32>
    %23 = arith.addf %20, %22 : vector<128x512xf32>
    %cst_10 = arith.constant 0.000000e+00 : f32
    %24 = vector.broadcast %cst_10 : f32 to vector<128x512xf32>
    %25 = arith.maximumf %23, %24 : vector<128x512xf32>
    %c0_11 = arith.constant 0 : index
    %c0_12 = arith.constant 0 : index
    %26 = vector.load %arg6[%c0_11, %c0_12] : memref<128x1xf32, #tpu.memory_space<vmem>>, vector<128x1xf32>
    %27 = vector.broadcast %26 : vector<128x1xf32> to vector<128x512xf32>
    %28 = arith.mulf %27, %25 : vector<128x512xf32>
    %cst_13 = arith.constant dense<0.000000e+00> : vector<512xf32>
    %29 = vector.multi_reduction <add>, %28, %cst_13 [0] : vector<128x512xf32> to vector<512xf32>
    %30 = vector.shape_cast %29 : vector<512xf32> to vector<1x512xf32>
    %c0_14 = arith.constant 0 : index
    %c0_15 = arith.constant 0 : index
    %31 = vector.load %arg7[%c0_14, %c0_15] : memref<1x1xf32, #tpu.memory_space<vmem>>, vector<1x1xf32>
    %32 = vector.broadcast %31 : vector<1x1xf32> to vector<1x512xf32>
    %33 = arith.addf %30, %32 : vector<1x512xf32>
    %c0_16 = arith.constant 0 : index
    %c0_17 = arith.constant 0 : index
    %34 = vector.load %arg8[%c0_16, %c0_17] : memref<1x512xf32, #tpu.memory_space<vmem>>, vector<1x512xf32>
    tpu.vector_store %arg8[%c0_16, %c0_17], %33 {strides = array<i32>} : memref<1x512xf32, #tpu.memory_space<vmem>>, vector<1x512xf32>,
    return
  }
  func.func @transform_0(%arg0: i32) -> (i32, i32) {
    %c0_i32 = arith.constant 0 : i32
    %c0_i32_0 = arith.constant 0 : i32
    return %c0_i32, %arg0 : i32, i32
  }
  func.func @transform_1(%arg0: i32) -> (i32, i32) {
    %c0_i32 = arith.constant 0 : i32
    %c0_i32_0 = arith.constant 0 : i32
    %c0_i32_1 = arith.constant 0 : i32
    return %c0_i32, %c0_i32_0 : i32, i32
  }
  func.func @transform_2(%arg0: i32) -> (i32, i32) {
    %c0_i32 = arith.constant 0 : i32
    %c0_i32_0 = arith.constant 0 : i32
    %c0_i32_1 = arith.constant 0 : i32
    return %c0_i32, %c0_i32_0 : i32, i32
  }
  func.func @transform_3(%arg0: i32) -> (i32, i32) {
    %c0_i32 = arith.constant 0 : i32
    %c0_i32_0 = arith.constant 0 : i32
    %c0_i32_1 = arith.constant 0 : i32
    return %c0_i32, %c0_i32_0 : i32, i32
  }
  func.func @transform_4(%arg0: i32) -> (i32, i32) {
    %c0_i32 = arith.constant 0 : i32
    %c0_i32_0 = arith.constant 0 : i32
    %c0_i32_1 = arith.constant 0 : i32
    return %c0_i32, %c0_i32_0 : i32, i32
  }
  func.func @transform_5(%arg0: i32) -> (i32, i32) {
    %c0_i32 = arith.constant 0 : i32
    %c0_i32_0 = arith.constant 0 : i32
    %c0_i32_1 = arith.constant 0 : i32
    return %c0_i32, %c0_i32_0 : i32, i32
  }
  func.func @transform_6(%arg0: i32) -> (i32, i32) {
    %c0_i32 = arith.constant 0 : i32
    %c0_i32_0 = arith.constant 0 : i32
    %c0_i32_1 = arith.constant 0 : i32
    return %c0_i32, %c0_i32_0 : i32, i32
  }
  func.func @transform_7(%arg0: i32) -> (i32, i32) {
    %c0_i32 = arith.constant 0 : i32
    %c0_i32_0 = arith.constant 0 : i32
    return %c0_i32, %arg0 : i32, i32
  }
}

</mosaic_0001>

<bundles_post_ra>
// kernel: deep_network_forward.1
= control target key start
LH: loop header
LB: loop body
LE: loop exit
PB: predicated region body
PF: predicated region fallthrough
CT: control target
= control target key end

     0   :  { %s1866_s26 = smov 0   ;;  %s2615_s0 = inlined_call_operand.vmem [shape: f32[2,1024], index: 0, kind: input, shape index: {}]   ;;  %s2616_s1 = inlined_call_operand.vmem [shape: f32[128,2], index: 1, kind: input, shape index: {}]   ;;  %s2617_s2 = inlined_call_operand.vmem [shape: f32[128,1], index: 2, kind: input, shape index: {}]   ;;  %s2618_s3 = inlined_call_operand.vmem [shape: bf16[128,128], index: 3, kind: input, shape index: {}]   ;;  %s2619_s4 = inlined_call_operand.vmem [shape: f32[128,1], index: 4, kind: input, shape index: {}]   ;;  %s2620_s5 = inlined_call_operand.vmem [shape: f32[128,1], index: 5, kind: input, shape index: {}]   ;;  %s2621_s6 = inlined_call_operand.<no memory space> [shape: f32[1,1], index: 6, kind: input, shape index: {}]   ;;  %s2622_s7 = inlined_call_operand.vmem [shape: f32[1,1024], index: 7, kind: output, shape index: {}]  }
   0x1   :  { %v12_v0 = vstv %s2621_s6 }
   0x2   :  { %13 = vst [vmem:[#allocation2] sm:$0x1] %v12_v0 }
   0x3 LB: > { %s1757_s27 = sadd.s32 4294967295, %s1818_s26   ;;  %p1761_p0 = scmp.ge.s32.totalorder %s1818_s26, 1  ;;  %s1818_s26 = sphi %s1866_s26, %s19_s26  }
   0x4   : > { %p240_p1 = scmp.lt.s32.totalorder %s1818_s26, 3 }
   0x6   : > { %p241_p2 = pnand %p1761_p0, %p240_p1 }
   0x8   : > { %244 = sbr.rel (%p241_p2) target bundleno = 592 (0x250), region = 48 }
   0xf   : > { %v286_v1 = vld [vmem:[%s2616_s1 + $0x10] sm:$0xff]  ;;  %v284_v2 = vld [vmem:[%s2616_s1] sm:$0xff]  ;;  %v1820_v3 = vmov 1   ;;  %v285_v5 = vld [vmem:[%s2616_s1 + $0x8] sm:$0xff]  ;;  %v2624_v6 = vmov 0   ;;  %s1762_s6 = sshll.u32 %s1757_s27, 2  ;;  %v2623_v56 = vlaneseq }
  0x10   : > { %1788 = vset.pattern.permute.xlu0 %v1820_v3  ;;  %1786 = vset.pattern.permute.xlu1 %v1820_v3  ;;  %v288_v4 = vld [vmem:[%s2616_s1 + $0x20] sm:$0xff]  ;;  %v290_v7 = vld [vmem:[%s2616_s1 + $0x30] sm:$0xff]  ;;  %v287_v8 = vld [vmem:[%s2616_s1 + $0x18] sm:$0xff]  ;;  %p272_p3 = scmp.lt.s32.totalorder %s1762_s6, 7 }
  0x11   : > { %490 = vperm.xlu0 %1788, %v286_v1   ;;  %482 = vperm.xlu1 %1786, %v284_v2   ;;  %v292_v9 = vld [vmem:[%s2616_s1 + $0x40] sm:$0xff]  ;;  %v294_v10 = vld [vmem:[%s2616_s1 + $0x50] sm:$0xff]  ;;  %v289_v14 = vld [vmem:[%s2616_s1 + $0x28] sm:$0xff]  ;;  %v2067_v60 = vshrl.u32 %v2623_v56, 7 }
  0x12   : > { %1157 = vmatprep.mubr.bf16.mxu0 %v2624_v6  ;;  %1270 = vmatprep.mubr.bf16.mxu1 %v2624_v6  ;;  %v709_v11 = vld [vmem:[%s2617_s2] sm:$0xff]  ;;  %v1917_v13 = vld [vmem:[%s2616_s1 + $0x70] sm:$0xff]  ;;  %v710_v16 = vld [vmem:[%s2617_s2 + $0x8] sm:$0xff]  ;;  %s2644_s6 = smov (!%p272_p3, %s1762_s6), 7 }
  0x13   : > { %v1910_v12 = vld [vmem:[%s2616_s1 + $0x60] sm:$0xff]  ;;  %v711_v15 = vld [vmem:[%s2617_s2 + $0x10] sm:$0xff]  ;;  %v712_v17 = vld [vmem:[%s2617_s2 + $0x18] sm:$0xff]  ;;  %s1763_s14 = sshll.u32 %s2644_s6, 1  ;;  %2631 = vst [vmem:[#allocation3_spill] sm:$0xff] %v2067_v60  ;;  %v547_v0 = vsub.s32 1, %v2067_v60  ;;  %s280_s22 = scalar_lea.vmem %s2622_s7, %s2644_s6 }
  0x14   : > { %v291_v18 = vld [vmem:[%s2616_s1 + $0x38] sm:$0xff]  ;;  %v714_v19 = vld [vmem:[%s2617_s2 + $0x28] sm:$0xff]  ;;  %v713_v21 = vld [vmem:[%s2617_s2 + $0x20] sm:$0xff]  ;;  %s275_s17 = scalar_lea.vmem %s2615_s0, %s1763_s14 }
  0x15   : > { %498 = vperm.xlu0 %1788, %v288_v4   ;;  %486 = vperm.xlu1 %1786, %v285_v5   ;;  %v716_v20 = vld [vmem:[%s2617_s2 + $0x38] sm:$0xff]  ;;  %v718_v22 = vld [vmem:[%s2617_s2 + $0x48] sm:$0xff]  ;;  %v981_v26 = vld [vmem:[%s2619_s4] sm:$0xff] }
  0x16   : > { %v720_v23 = vld [vmem:[%s2617_s2 + $0x58] sm:$0xff]  ;;  %v293_v24 = vld [vmem:[%s2616_s1 + $0x48] sm:$0xff]  ;;  %v983_v27 = vld [vmem:[%s2619_s4 + $0x10] sm:$0xff] }
  0x17   : > { %v722_v25 = vld [vmem:[%s2617_s2 + $0x68] sm:$0xff]  ;;  %v715_v28 = vld [vmem:[%s2617_s2 + $0x30] sm:$0xff]  ;;  %v1415_v29 = vld [vmem:[%s2620_s5] sm:$0xff] }
  0x18   : > { %v985_v30 = vld [vmem:[%s2619_s4 + $0x20] sm:$0xff]  ;;  %v295_v31 = vld [vmem:[%s2616_s1 + $0x58] sm:$0xff]  ;;  %v986_v32 = vld [vmem:[%s2619_s4 + $0x28] sm:$0xff] }
  0x19   : > { %506 = vperm.xlu0 %1788, %v290_v7   ;;  %1787 = vset.pattern.permute.xlu1 %v2624_v6  ;;  %v987_v33 = vld [vmem:[%s2619_s4 + $0x30] sm:$0xff]  ;;  %v717_v34 = vld [vmem:[%s2617_s2 + $0x40] sm:$0xff]  ;;  %v988_v35 = vld [vmem:[%s2619_s4 + $0x38] sm:$0xff] }
  0x1a   : > { %317 = vperm.xlu1 %1787, %v287_v8   ;;  %v989_v36 = vld [vmem:[%s2619_s4 + $0x40] sm:$0xff]  ;;  %v297_v37 = vld [vmem:[%s2616_s1 + $0x68] sm:$0xff]  ;;  %v991_v39 = vld [vmem:[%s2619_s4 + $0x50] sm:$0xff] }
  0x1b   : > { %v990_v38 = vld [vmem:[%s2619_s4 + $0x48] sm:$0xff]  ;;  %v992_v40 = vld [vmem:[%s2619_s4 + $0x58] sm:$0xff]  ;;  %v719_v41 = vld [vmem:[%s2617_s2 + $0x50] sm:$0xff] }
  0x1c   : > { %v993_v42 = vld [vmem:[%s2619_s4 + $0x60] sm:$0xff]  ;;  %v994_v43 = vld [vmem:[%s2619_s4 + $0x68] sm:$0xff]  ;;  %v299_v44 = vld [vmem:[%s2616_s1 + $0x78] sm:$0xff] }
  0x1d   : > { %514 = vperm.xlu0 %1788, %v292_v9   ;;  %v995_v45 = vld [vmem:[%s2619_s4 + $0x70] sm:$0xff]  ;;  %v996_v46 = vld [vmem:[%s2619_s4 + $0x78] sm:$0xff]  ;;  %v721_v47 = vld [vmem:[%s2617_s2 + $0x60] sm:$0xff] }
  0x1e   : > { %1789 = vset.pattern.permute.xlu1 %v1820_v3  ;;  %v1429_v48 = vld [vmem:[%s2620_s5 + $0x70] sm:$0xff]  ;;  %v1659_v52 = vld [vmem:[#allocation2] sm:$0x1]  ;;  %v724_v55 = vld [vmem:[%s2617_s2 + $0x78] sm:$0xff] }
  0x1f   : > { %494 = vperm.xlu1 %1789, %v287_v8   ;;  %v723_v51 = vld [vmem:[%s2617_s2 + $0x70] sm:$0xff]  ;;  %v982_v59 = vld [vmem:[%s2619_s4 + $0x8] sm:$0xff]  ;;  %v984_v62 = vld [vmem:[%s2619_s4 + $0x18] sm:$0xff]  ;;  %v2087_v8 = vsub.s32 0, %v2067_v60 }
  0x21   : > { %522 = vperm.xlu0 %1788, %v294_v10   ;;  %2633 = vst [vmem:[#allocation5_spill] sm:$0xff] %v2087_v8 }
  0x23   : > { %1790 = vset.pattern.permute.xlu1 %v2624_v6 }
  0x24   : > { %727 = vperm.xlu1 %1790, %v709_v11  }
  0x25   : > { %530 = vperm.xlu0 %1788, %v1910_v12  }
  0x28   : > { %322 = vperm.xlu1 %1790, %v288_v4   ;;  %v283_v4 = vld [vmem:[%s275_s17] sm:$0xff] }
  0x29   : > { %538 = vperm.xlu0 %1788, %v1917_v13  }
  0x2c   : > { %327 = vperm.xlu1 %1790, %v289_v14  }
  0x2d   : > { %1801 = vset.pattern.permute.xlu0 %v2624_v6 }
  0x2e   : > { %302 = vperm.xlu0 %1801, %v284_v2   ;;  %v555_v2 = vsub.s32 5, %v2067_v60 }
  0x30   : > { %1791 = vset.pattern.permute.xlu1 %v1820_v3 }
  0x31   : > { %502 = vperm.xlu1 %1791, %v289_v14  }
  0x32   : > { %307 = vperm.xlu0 %1801, %v285_v5  }
  0x35   : > { %1792 = vset.pattern.permute.xlu1 %v2624_v6 }
  0x36   : > { %312 = vperm.xlu0 %1801, %v286_v1   ;;  %737 = vperm.xlu1 %1792, %v711_v15   ;;  %v551_v1 = vsub.s32 3, %v2067_v60  ;;  %v556_v15 = vrot.slane %v283_v4, %v555_v2 }
  0x38   : > { %v552_v11 = vrot.slane %v283_v4, %v551_v1 }
  0x3a   : > { %732 = vperm.xlu0 %1801, %v710_v16   ;;  %332 = vperm.xlu1 %1792, %v290_v7   ;;  %v1416_v7 = vld [vmem:[%s2620_s5 + $0x8] sm:$0xff] }
  0x3e   : > { %742 = vperm.xlu0 %1801, %v712_v17   ;;  %337 = vperm.xlu1 %1792, %v291_v18  }
  0x42   : > { %752 = vperm.xlu0 %1801, %v714_v19   ;;  %1793 = vset.pattern.permute.xlu1 %v1820_v3  ;;  %v384_v19 = vrot.slane %v283_v4, %v2087_v8 }
  0x43   : > { %510 = vperm.xlu1 %1793, %v291_v18   ;;  %v1417_v18 = vld [vmem:[%s2620_s5 + $0x10] sm:$0xff] }
  0x46   : > { %762 = vperm.xlu0 %1801, %v716_v20  }
  0x47   : > { %1794 = vset.pattern.permute.xlu1 %v2624_v6 }
  0x48   : > { %747 = vperm.xlu1 %1794, %v713_v21  }
  0x4a   : > { %772 = vperm.xlu0 %1801, %v718_v22   ;;  %v2102_v22 = vrot.slane %v552_v11, %v547_v0 }
  0x4c   : > { %342 = vperm.xlu1 %1794, %v292_v9   ;;  %v387_v9 = vsub.s32 2, %v2067_v60 }
  0x4e   : > { %782 = vperm.xlu0 %1801, %v720_v23   ;;  %v388_v20 = vrot.slane %v283_v4, %v387_v9 }
  0x50   : > { %347 = vperm.xlu1 %1794, %v293_v24  }
  0x52   : > { %792 = vperm.xlu0 %1801, %v722_v25  }
  0x54   : > { %1795 = vset.pattern.permute.xlu1 %v1820_v3 }
  0x55   : > { %518 = vperm.xlu1 %1795, %v293_v24  }
  0x56   : > { %999 = vperm.xlu0 %1801, %v981_v26   ;;  %v2104_v26 = vrot.slane %v556_v15, %v547_v0 }
  0x59   : > { %1796 = vset.pattern.permute.xlu1 %v2624_v6 }
  0x5a   : > { %1009 = vperm.xlu0 %1801, %v983_v27   ;;  %757 = vperm.xlu1 %1796, %v715_v28  }
  0x5e   : > { %1433 = vperm.xlu0 %1801, %v1415_v29   ;;  %352 = vperm.xlu1 %1796, %v294_v10   ;;  %v548_v10 = vrot.slane %v283_v4, %v547_v0  ;;  %v1418_v29 = vld [vmem:[%s2620_s5 + $0x18] sm:$0xff] }
  0x60   : > { %v2100_v21 = vrot.slane %v548_v10, %v547_v0  ;;  %v1420_v10 = vld [vmem:[%s2620_s5 + $0x28] sm:$0xff] }
  0x62   : > { %1019 = vperm.xlu0 %1801, %v985_v30   ;;  %357 = vperm.xlu1 %1796, %v295_v31   ;;  %v2114_v30 = vrot.slane %v384_v19, %v2087_v8 }
  0x66   : > { %1024 = vperm.xlu0 %1801, %v986_v32   ;;  %1797 = vset.pattern.permute.xlu1 %v1820_v3 }
  0x67   : > { %526 = vperm.xlu1 %1797, %v295_v31   ;;  %v2117_v31 = vrot.slane %v388_v20, %v2087_v8 }
  0x6a   : > { %1029 = vperm.xlu0 %1801, %v987_v33  }
  0x6b   : > { %1798 = vset.pattern.permute.xlu1 %v2624_v6 }
  0x6c   : > { %767 = vperm.xlu1 %1798, %v717_v34  }
  0x6e   : > { %1034 = vperm.xlu0 %1801, %v988_v35  }
  0x70   : > { %362 = vperm.xlu1 %1798, %v1910_v12   ;;  %v391_v12 = vsub.s32 4, %v2067_v60 }
  0x72   : > { %1039 = vperm.xlu0 %1801, %v989_v36   ;;  %v392_v23 = vrot.slane %v283_v4, %v391_v12 }
  0x74   : > { %367 = vperm.xlu1 %1798, %v297_v37   ;;  %v2126_v34 = vrot.slane %v392_v23, %v2087_v8 }
  0x76   : > { %1044 = vperm.xlu0 %1801, %v990_v38  }
  0x78   : > { %1799 = vset.pattern.permute.xlu1 %v1820_v3 }
  0x79   : > { %534 = vperm.xlu1 %1799, %v297_v37  }
  0x7a   : > { %1049 = vperm.xlu0 %1801, %v991_v39  }
  0x7d   : > { %1800 = vset.pattern.permute.xlu1 %v2624_v6 }
  0x7e   : > { %1054 = vperm.xlu0 %1801, %v992_v40   ;;  %777 = vperm.xlu1 %1800, %v719_v41  }
  0x82   : > { %1059 = vperm.xlu0 %1801, %v993_v42   ;;  %372 = vperm.xlu1 %1800, %v1917_v13   ;;  %v395_v13 = vsub.s32 6, %v2067_v60 }
  0x84   : > { %v396_v24 = vrot.slane %v283_v4, %v395_v13 }
  0x86   : > { %1064 = vperm.xlu0 %1801, %v994_v43   ;;  %377 = vperm.xlu1 %1800, %v299_v44   ;;  %v2129_v35 = vrot.slane %v396_v24, %v2087_v8 }
  0x8a   : > { %1069 = vperm.xlu0 %1801, %v995_v45   ;;  %1802 = vset.pattern.permute.xlu1 %v1820_v3  ;;  %v559_v3 = vsub.s32 7, %v2067_v60 }
  0x8b   : > { %542 = vperm.xlu1 %1802, %v299_v44  }
  0x8c   : > { %v560_v16 = vrot.slane %v283_v4, %v559_v3 }
  0x8e   : > { %1074 = vperm.xlu0 %1801, %v996_v46   ;;  %v2106_v27 = vrot.slane %v560_v16, %v547_v0  ;;  %v1419_v46 = vld [vmem:[%s2620_s5 + $0x20] sm:$0xff] }
  0x8f   : > { %1803 = vset.pattern.permute.xlu1 %v2624_v6 }
  0x90   : > { %787 = vperm.xlu1 %1803, %v721_v47   ;;  %v2042_v49 = vpop.permute.xlu1 %482  ;;  %v2044_v50 = vpop.permute.xlu0 %490 }
  0x91   : > { %v2121_v32 = vmul.f32 %v2100_v21, %v2042_v49  ;;  %v582_v33 = vmul.f32 %v2102_v22, %v2042_v49  ;;  %v2135_v37 = vmul.f32 %v2104_v26, %v2042_v49  ;;  %v584_v38 = vmul.f32 %v2106_v27, %v2042_v49 }
  0x92   : > { %1503 = vperm.xlu0 %1801, %v1429_v48   ;;  %v2141_v39 = vmul.f32 %v2100_v21, %v2044_v50  ;;  %v2145_v40 = vmul.f32 %v2102_v22, %v2044_v50  ;;  %v2149_v41 = vmul.f32 %v2104_v26, %v2044_v50  ;;  %v2153_v42 = vmul.f32 %v2106_v27, %v2044_v50 }
  0x94   : > { %797 = vperm.xlu1 %1803, %v723_v51   ;;  %v2049_v53 = vpop.permute.xlu1 %486  ;;  %v2051_v54 = vpop.permute.xlu0 %498 }
  0x95   : > { %v2157_v43 = vmul.f32 %v2100_v21, %v2049_v53  ;;  %v586_v44 = vmul.f32 %v2102_v22, %v2049_v53  ;;  %v2166_v47 = vmul.f32 %v2104_v26, %v2049_v53  ;;  %v588_v48 = vmul.f32 %v2106_v27, %v2049_v53 }
  0x96   : > { %1662 = vperm.xlu0 %1801, %v1659_v52   ;;  %v597_v51 = vmul.f32 %v2100_v21, %v2051_v54  ;;  %v598_v52 = vmul.f32 %v2102_v22, %v2051_v54  ;;  %v2195_v11 = vmul.f32 %v2104_v26, %v2051_v54  ;;  %v2199_v12 = vmul.f32 %v2106_v27, %v2051_v54 }
  0x98   : > { %802 = vperm.xlu1 %1803, %v724_v55   ;;  %v2058_v57 = vpop.permute.xlu0 %506 }
  0x99   : > { %v2060_v58 = vpop.permute.xlu1 %317 }
  0x9a   : > { %v430_v53 = vmul.f32 %v2117_v31, %v2060_v58  ;;  %v431_v3 = vmul.f32 %v2126_v34, %v2060_v58  ;;  %v432_v4 = vmul.f32 %v2129_v35, %v2060_v58 }
  0x9c   : > { %1004 = vperm.xlu1 %1803, %v982_v59   ;;  %v2069_v61 = vpop.permute.xlu0 %514 }
  0x9e   : > { %v495_v63 = vpop.permute.xlu1 %494 }
  0x9f   : > { %v593_v49 = vmul.f32 %v2100_v21, %v495_v63  ;;  %v594_v50 = vmul.f32 %v2102_v22, %v495_v63  ;;  %v595_v55 = vmul.f32 %v2104_v26, %v495_v63  ;;  %v596_v59 = vmul.f32 %v2106_v27, %v495_v63 }
  0xa0   : > { %1014 = vperm.xlu1 %1803, %v984_v62   ;;  %v2081_v5 = vpop.permute.xlu0 %522  ;;  %v429_v62 = vmul.f32 %v2114_v30, %v2060_v58 }
  0xa1   : > { %2632 = vst [vmem:[#allocation4_spill] sm:$0xff] %v2081_v5  ;;  %v658_v15 = vadd.f32 %v594_v50, %v430_v53  ;;  %v660_v19 = vadd.f32 %v596_v59, %v432_v4 }
  0xa2   : > { %v657_v13 = vadd.f32 %v593_v49, %v429_v62 }
  0xa3   : > { %v2092_v14 = vpop.permute.xlu1 %727 }
  0xa4   : > { %1438 = vperm.xlu1 %1803, %v1416_v7   ;;  %v2094_v17 = vpop.permute.xlu0 %530 }
  0xa5   : > { %2634 = vst [vmem:[#allocation6_spill] sm:$0xff] %v2094_v17 }
  0xa7   : > { %v323_v25 = vpop.permute.xlu1 %322 }
  0xa8   : > { %1443 = vperm.xlu1 %1803, %v1417_v18   ;;  %v2108_v28 = vpop.permute.xlu0 %538  ;;  %v433_v0 = vmul.f32 %v2114_v30, %v323_v25  ;;  %v434_v1 = vmul.f32 %v2117_v31, %v323_v25  ;;  %v2202_v58 = vmul.f32 %v2126_v34, %v323_v25  ;;  %v659_v18 = vadd.f32 %v595_v55, %v431_v3 }
  0xa9   : > { %2635 = vst [vmem:[#allocation7_spill] sm:$0xff] %v2108_v28  ;;  %v2206_v20 = vmul.f32 %v2129_v35, %v323_v25  ;;  %v1421_v25 = vld [vmem:[%s2620_s5 + $0x30] sm:$0xff] }
  0xaa   : > { %v2209_v24 = vadd.f32 %v597_v51, %v433_v0 }
  0xab   : > { %v2131_v36 = vpop.permute.xlu1 %327 }
  0xac   : > { %1448 = vperm.xlu1 %1803, %v1418_v29   ;;  %v2211_v29 = vadd.f32 %v598_v52, %v434_v1  ;;  %v2215_v54 = vmul.f32 %v2114_v30, %v2131_v36  ;;  %v2227_v53 = vmul.f32 %v2117_v31, %v2131_v36 }
  0xad   : > { %v303_v45 = vpop.permute.xlu0 %302 }
  0xae   : > { %v418_v63 = vmul.f32 %v2117_v31, %v303_v45  ;;  %v420_v7 = vmul.f32 %v2129_v35, %v303_v45  ;;  %v417_v16 = vmul.f32 %v2114_v30, %v303_v45  ;;  %v419_v23 = vmul.f32 %v2126_v34, %v303_v45 }
  0xb0   : > { %1453 = vperm.xlu1 %1803, %v1419_v46   ;;  %v503_v2 = vpop.permute.xlu1 %502  ;;  %v646_v55 = vadd.f32 %v582_v33, %v418_v63  ;;  %v648_v59 = vadd.f32 %v584_v38, %v420_v7  ;;  %v645_v3 = vadd.f32 %v2121_v32, %v417_v16  ;;  %v647_v63 = vadd.f32 %v2135_v37, %v419_v23  ;;  %v1422_v32 = vld [vmem:[%s2620_s5 + $0x38] sm:$0xff] }
  0xb1   : > { %v308_v9 = vpop.permute.xlu0 %307  ;;  %v2233_v33 = vmul.f32 %v2100_v21, %v503_v2  ;;  %v2236_v38 = vmul.f32 %v2102_v22, %v503_v2  ;;  %v2239_v4 = vmul.f32 %v2104_v26, %v503_v2  ;;  %v604_v23 = vmul.f32 %v2106_v27, %v503_v2 }
  0xb2   : > { %v422_v46 = vmul.f32 %v2117_v31, %v308_v9  ;;  %v421_v45 = vmul.f32 %v2114_v30, %v308_v9  ;;  %v423_v51 = vmul.f32 %v2126_v34, %v308_v9  ;;  %v424_v52 = vmul.f32 %v2129_v35, %v308_v9 }
  0xb3   : > { %v806_v56 = vadd.f32 %v2092_v14, %v646_v55  ;;  %v808_v6 = vadd.f32 %v2092_v14, %v648_v59  ;;  %v805_v17 = vadd.f32 %v2092_v14, %v645_v3 }
  0xb4   : > { %1458 = vperm.xlu1 %1803, %v1420_v10   ;;  %v650_v16 = vadd.f32 %v586_v44, %v422_v46  ;;  %v652_v8 = vadd.f32 %v588_v48, %v424_v52  ;;  %v651_v37 = vadd.f32 %v2166_v47, %v423_v51 }
  0xb5   : > { %v313_v49 = vpop.permute.xlu0 %312  ;;  %v738_v50 = vpop.permute.xlu1 %737  ;;  %v870_v47 = vmax.f32 %v806_v56, 0.0  ;;  %v869_v3 = vmax.f32 %v805_v17, 0.0  ;;  %v1424_v17 = vld [vmem:[%s2620_s5 + $0x48] sm:$0xff] }
  0xb6   : > { %v426_v62 = vmul.f32 %v2117_v31, %v313_v49  ;;  %v425_v0 = vmul.f32 %v2114_v30, %v313_v49  ;;  %v428_v1 = vmul.f32 %v2129_v35, %v313_v49  ;;  %v427_v7 = vmul.f32 %v2126_v34, %v313_v49 }
  0xb8   : > { %1463 = vperm.xlu1 %1803, %v1421_v25   ;;  %v654_v60 = vadd.f32 %v2145_v40, %v426_v62  ;;  %v649_v25 = vadd.f32 %v2157_v43, %v421_v45  ;;  %v653_v49 = vadd.f32 %v2141_v39, %v425_v0  ;;  %v656_v28 = vadd.f32 %v2153_v42, %v428_v1  ;;  %v1423_v43 = vld [vmem:[%s2620_s5 + $0x40] sm:$0xff] }
  0xb9   : > { %v733_v9 = vpop.permute.xlu0 %732  ;;  %v2243_v10 = vpop.permute.xlu1 %332  ;;  %v655_v40 = vadd.f32 %v2149_v41, %v427_v7  ;;  %v872_v39 = vmax.f32 %v808_v6, 0.0  ;;  %v807_v42 = vadd.f32 %v2092_v14, %v647_v63  ;;  %v440_v63 = vmul.f32 %v2129_v35, %v2131_v36 }
  0xba   : > { %v810_v44 = vadd.f32 %v733_v9, %v650_v16  ;;  %v812_v46 = vadd.f32 %v733_v9, %v652_v8  ;;  %v809_v55 = vadd.f32 %v733_v9, %v649_v25  ;;  %v811_v59 = vadd.f32 %v733_v9, %v651_v37 }
  0xbb   : > { %v814_v2 = vadd.f32 %v738_v50, %v654_v60  ;;  %v813_v8 = vadd.f32 %v738_v50, %v653_v49  ;;  %v816_v0 = vadd.f32 %v738_v50, %v656_v28  ;;  %v815_v16 = vadd.f32 %v738_v50, %v655_v40 }
  0xbc   : > { %1468 = vperm.xlu1 %1803, %v1422_v32   ;;  %v874_v41 = vmax.f32 %v810_v44, 0.0  ;;  %v876_v7 = vmax.f32 %v812_v46, 0.0  ;;  %v873_v9 = vmax.f32 %v809_v55, 0.0  ;;  %v875_v32 = vmax.f32 %v811_v59, 0.0 }
  0xbd   : > { %v743_v48 = vpop.permute.xlu0 %742  ;;  %v2258_v52 = vpop.permute.xlu1 %337  ;;  %v871_v25 = vmax.f32 %v807_v42, 0.0  ;;  %v878_v60 = vmax.f32 %v814_v2, 0.0  ;;  %v880_v28 = vmax.f32 %v816_v0, 0.0  ;;  %v439_v50 = vmul.f32 %v2126_v34, %v2131_v36 }
  0xbe   : > { %v817_v45 = vadd.f32 %v743_v48, %v657_v13  ;;  %v818_v51 = vadd.f32 %v743_v48, %v658_v15  ;;  %v820_v62 = vadd.f32 %v743_v48, %v660_v19  ;;  %v819_v1 = vadd.f32 %v743_v48, %v659_v18 }
  0xbf   : > { %v950_v6 = vpack.c.bf16 %v874_v41, %v870_v47  ;;  %v952_v5 = vpack.c.bf16 %v876_v7, %v872_v39  ;;  %v949_v15 = vpack.c.bf16 %v873_v9, %v869_v3  ;;  %v951_v19 = vpack.c.bf16 %v875_v32, %v871_v25  ;;  %v1427_v25 = vld [vmem:[%s2620_s5 + $0x60] sm:$0xff] }
  0xc0   : > { %1473 = vperm.xlu1 %1803, %v1423_v43   ;;  %v882_v37 = vmax.f32 %v818_v51, 0.0  ;;  %v884_v56 = vmax.f32 %v820_v62, 0.0  ;;  %v881_v13 = vmax.f32 %v817_v45, 0.0  ;;  %v883_v18 = vmax.f32 %v819_v1, 0.0 }
  0xc1   : > { %1125 = vmatprep.subr.bf16.mxu0 %v950_v6  ;;  %1238 = vmatprep.subr.bf16.mxu1 %v952_v5  ;;  %v753_v49 = vpop.permute.xlu0 %752  ;;  %v665_v44 = vadd.f32 %v2233_v33, %v2215_v54  ;;  %v877_v46 = vmax.f32 %v813_v8, 0.0  ;;  %v666_v55 = vadd.f32 %v2236_v38, %v2227_v53  ;;  %v879_v48 = vmax.f32 %v815_v16, 0.0  ;;  %v1425_v53 = vld [vmem:[%s2620_s5 + $0x50] sm:$0xff]  ;;  %v1426_v8 = vld [vmem:[%s2620_s5 + $0x58] sm:$0xff] }
  0xc2   : > { %v2264_v14 = vpop.permute.xlu1 %510  ;;  %1126 = vmatpush1.bf16.msra.mxu0 %v949_v15  ;;  %1239 = vmatpush1.bf16.msra.mxu1 %v951_v19  ;;  %v954_v59 = vpack.c.bf16 %v882_v37, %v878_v60  ;;  %v956_v40 = vpack.c.bf16 %v884_v56, %v880_v28  ;;  %v667_v43 = vadd.f32 %v2239_v4, %v439_v50 }
  0xc3   : > { %v668_v47 = vadd.f32 %v604_v23, %v440_v63  ;;  %v953_v36 = vpack.c.bf16 %v881_v13, %v877_v46  ;;  %v663_v5 = vadd.f32 %v2195_v11, %v2202_v58  ;;  %v825_v39 = vadd.f32 %v753_v49, %v665_v44  ;;  %v1428_v63 = vld [vmem:[%s2620_s5 + $0x68] sm:$0xff] }
  0xc4   : > { %1478 = vperm.xlu1 %1803, %v1424_v17   ;;  %v826_v42 = vadd.f32 %v753_v49, %v666_v55  ;;  %1127 = vmatprep.subr.bf16.mxu0 %v954_v59  ;;  %v955_v54 = vpack.c.bf16 %v883_v18, %v879_v48  ;;  %v827_v38 = vadd.f32 %v753_v49, %v667_v43 }
  0xc5   : > { %1240 = vmatprep.subr.bf16.mxu1 %v956_v40  ;;  %v664_v4 = vadd.f32 %v2199_v12, %v2206_v20  ;;  %v828_v2 = vadd.f32 %v753_v49, %v668_v47  ;;  %v889_v12 = vmax.f32 %v825_v39, 0.0  ;;  %v605_v37 = vmul.f32 %v2100_v21, %v2058_v57  ;;  %v763_v43 = vpop.permute.xlu0 %762  ;;  %v1430_v47 = vld [vmem:[%s2620_s5 + $0x78] sm:$0xff] }
  0xc6   : > { %1128 = vmatpush1.bf16.msra.mxu0 %v953_v36  ;;  %1241 = vmatpush1.bf16.msra.mxu1 %v955_v54  ;;  %v890_v1 = vmax.f32 %v826_v42, 0.0  ;;  %v609_v56 = vmul.f32 %v2100_v21, %v2264_v14  ;;  %v610_v6 = vmul.f32 %v2102_v22, %v2264_v14  ;;  %v611_v60 = vmul.f32 %v2104_v26, %v2264_v14 }
  0xc7   : > { %v748_v33 = vpop.permute.xlu1 %747  ;;  %v892_v7 = vmax.f32 %v828_v2, 0.0  ;;  %v612_v13 = vmul.f32 %v2106_v27, %v2264_v14  ;;  %v606_v15 = vmul.f32 %v2102_v22, %v2058_v57  ;;  %v607_v19 = vmul.f32 %v2104_v26, %v2058_v57 }
  0xc8   : > { %v821_v23 = vadd.f32 %v748_v33, %v2209_v24  ;;  %v822_v11 = vadd.f32 %v748_v33, %v2211_v29  ;;  %v823_v58 = vadd.f32 %v748_v33, %v663_v5  ;;  %v824_v45 = vadd.f32 %v748_v33, %v664_v4  ;;  %1483 = vperm.xlu1 %1803, %v1425_v53  }
  0xc9   : > { %v891_v24 = vmax.f32 %v827_v38, 0.0  ;;  %v608_v17 = vmul.f32 %v2106_v27, %v2058_v57  ;;  %v445_v28 = vmul.f32 %v2114_v30, %v2258_v52  ;;  %v446_v18 = vmul.f32 %v2117_v31, %v2258_v52 }
  0xca   : > { %v885_v51 = vmax.f32 %v821_v23, 0.0  ;;  %v886_v0 = vmax.f32 %v822_v11, 0.0  ;;  %v887_v20 = vmax.f32 %v823_v58, 0.0  ;;  %v888_v41 = vmax.f32 %v824_v45, 0.0 }
  0xcb   : > { %v2287_v62 = vpop.permute.xlu1 %342  ;;  %v447_v14 = vmul.f32 %v2126_v34, %v2258_v52  ;;  %v448_v50 = vmul.f32 %v2129_v35, %v2258_v52  ;;  %v441_v57 = vmul.f32 %v2114_v30, %v2243_v10  ;;  %v442_v49 = vmul.f32 %v2117_v31, %v2243_v10 }
  0xcc   : > { %v958_v3 = vpack.c.bf16 %v890_v1, %v886_v0  ;;  %v957_v9 = vpack.c.bf16 %v889_v12, %v885_v51  ;;  %1488 = vperm.xlu1 %1803, %v1426_v8   ;;  %v959_v29 = vpack.c.bf16 %v891_v24, %v887_v20  ;;  %v960_v32 = vpack.c.bf16 %v892_v7, %v888_v41 }
  0xcd   : > { %v443_v44 = vmul.f32 %v2126_v34, %v2243_v10  ;;  %v444_v46 = vmul.f32 %v2129_v35, %v2243_v10  ;;  %v673_v59 = vadd.f32 %v609_v56, %v445_v28  ;;  %v674_v40 = vadd.f32 %v610_v6, %v446_v18 }
  0xce   : > { %1129 = vmatprep.subr.bf16.mxu0 %v958_v3  ;;  %1242 = vmatprep.subr.bf16.mxu1 %v960_v32  ;;  %v675_v52 = vadd.f32 %v611_v60, %v447_v14  ;;  %v676_v48 = vadd.f32 %v612_v13, %v448_v50  ;;  %v669_v36 = vadd.f32 %v605_v37, %v441_v57 }
  0xcf   : > { %v2292_v16 = vpop.permute.xlu1 %347  ;;  %1130 = vmatpush1.bf16.msra.mxu0 %v957_v9  ;;  %1243 = vmatpush1.bf16.msra.mxu1 %v959_v29  ;;  %v670_v5 = vadd.f32 %v606_v15, %v442_v49  ;;  %v671_v39 = vadd.f32 %v607_v19, %v443_v44  ;;  %v672_v42 = vadd.f32 %v608_v17, %v444_v46 }
  0xd0   : > { %1493 = vperm.xlu1 %1803, %v1427_v25   ;;  %v833_v54 = vadd.f32 %v763_v43, %v673_v59  ;;  %v834_v33 = vadd.f32 %v763_v43, %v674_v40  ;;  %v835_v53 = vadd.f32 %v763_v43, %v675_v52  ;;  %v836_v38 = vadd.f32 %v763_v43, %v676_v48  ;;  %v773_v59 = vpop.permute.xlu0 %772 }
  0xd1   : > { %v613_v6 = vmul.f32 %v2100_v21, %v2069_v61  ;;  %v614_v60 = vmul.f32 %v2102_v22, %v2069_v61  ;;  %v615_v13 = vmul.f32 %v2104_v26, %v2069_v61  ;;  %v616_v15 = vmul.f32 %v2106_v27, %v2069_v61 }
  0xd2   : > { %v898_v1 = vmax.f32 %v834_v33, 0.0  ;;  %v900_v12 = vmax.f32 %v836_v38, 0.0  ;;  %v897_v20 = vmax.f32 %v833_v54, 0.0  ;;  %v899_v24 = vmax.f32 %v835_v53, 0.0 }
  0xd3   : > { %v453_v19 = vmul.f32 %v2114_v30, %v2292_v16  ;;  %v454_v17 = vmul.f32 %v2117_v31, %v2292_v16  ;;  %v455_v28 = vmul.f32 %v2126_v34, %v2292_v16  ;;  %v456_v18 = vmul.f32 %v2129_v35, %v2292_v16 }
  0xd4   : > { %v519_v55 = vpop.permute.xlu1 %518  ;;  %1498 = vperm.xlu1 %1803, %v1428_v63   ;;  %v449_v14 = vmul.f32 %v2114_v30, %v2287_v62  ;;  %v450_v50 = vmul.f32 %v2117_v31, %v2287_v62  ;;  %v451_v61 = vmul.f32 %v2126_v34, %v2287_v62  ;;  %v452_v63 = vmul.f32 %v2129_v35, %v2287_v62 }
  0xd5   : > { %v617_v32 = vmul.f32 %v2100_v21, %v519_v55  ;;  %v618_v25 = vmul.f32 %v2102_v22, %v519_v55  ;;  %v619_v37 = vmul.f32 %v2104_v26, %v519_v55  ;;  %v620_v56 = vmul.f32 %v2106_v27, %v519_v55 }
  0xd6   : > { %v677_v40 = vadd.f32 %v613_v6, %v449_v14  ;;  %v678_v16 = vadd.f32 %v614_v60, %v450_v50  ;;  %v679_v52 = vadd.f32 %v615_v13, %v451_v61  ;;  %v680_v48 = vadd.f32 %v616_v15, %v452_v63  ;;  %v2636_v14 = vld [vmem:[#allocation4_spill] sm:$0xff] }
  0xd7   : > { %v681_v49 = vadd.f32 %v617_v32, %v453_v19  ;;  %v682_v44 = vadd.f32 %v618_v25, %v454_v17  ;;  %v683_v46 = vadd.f32 %v619_v37, %v455_v28  ;;  %v684_v55 = vadd.f32 %v620_v56, %v456_v18 }
  0xd8   : > { %1508 = vperm.xlu1 %1803, %v1430_v47   ;;  %v622_v50 = vmul.f32 %v2102_v22, %v2636_v14  ;;  %v623_v61 = vmul.f32 %v2104_v26, %v2636_v14  ;;  %v624_v63 = vmul.f32 %v2106_v27, %v2636_v14 }
  0xd9   : > { %v758_v10 = vpop.permute.xlu1 %757  ;;  %v842_v47 = vadd.f32 %v773_v59, %v682_v44 }
  0xda   : > { %v829_v4 = vadd.f32 %v758_v10, %v669_v36  ;;  %v830_v23 = vadd.f32 %v758_v10, %v670_v5  ;;  %v831_v2 = vadd.f32 %v758_v10, %v671_v39  ;;  %v832_v11 = vadd.f32 %v758_v10, %v672_v42 }
  0xdb   : > { %v844_v36 = vadd.f32 %v773_v59, %v684_v55  ;;  %v841_v5 = vadd.f32 %v773_v59, %v681_v49  ;;  %v843_v39 = vadd.f32 %v773_v59, %v683_v46 }
  0xdc   : > { %v894_v58 = vmax.f32 %v830_v23, 0.0  ;;  %v896_v45 = vmax.f32 %v832_v11, 0.0  ;;  %v893_v51 = vmax.f32 %v829_v4, 0.0  ;;  %v895_v8 = vmax.f32 %v831_v2, 0.0 }
  0xdd   : > { %v2335_v0 = vpop.permute.xlu1 %352  ;;  %v906_v2 = vmax.f32 %v842_v47, 0.0  ;;  %v908_v11 = vmax.f32 %v844_v36, 0.0 }
  0xde   : > { %v962_v3 = vpack.c.bf16 %v898_v1, %v894_v58  ;;  %v964_v41 = vpack.c.bf16 %v900_v12, %v896_v45  ;;  %v961_v7 = vpack.c.bf16 %v897_v20, %v893_v51  ;;  %v963_v9 = vpack.c.bf16 %v899_v24, %v895_v8 }
  0xdf   : > { %v905_v58 = vmax.f32 %v841_v5, 0.0  ;;  %v907_v45 = vmax.f32 %v843_v39, 0.0  ;;  %v457_v56 = vmul.f32 %v2114_v30, %v2335_v0  ;;  %v458_v6 = vmul.f32 %v2117_v31, %v2335_v0 }
  0xe0   : > { %1131 = vmatprep.subr.bf16.mxu0 %v962_v3  ;;  %1244 = vmatprep.subr.bf16.mxu1 %v964_v41  ;;  %v459_v60 = vmul.f32 %v2126_v34, %v2335_v0  ;;  %v460_v13 = vmul.f32 %v2129_v35, %v2335_v0 }
  0xe1   : > { %v2337_v29 = vpop.permute.xlu1 %357  ;;  %1132 = vmatpush1.bf16.msra.mxu0 %v961_v7  ;;  %1245 = vmatpush1.bf16.msra.mxu1 %v963_v9  ;;  %v686_v0 = vadd.f32 %v622_v50, %v458_v6 }
  0xe2   : > { %v461_v9 = vmul.f32 %v2114_v30, %v2337_v29  ;;  %v462_v32 = vmul.f32 %v2117_v31, %v2337_v29  ;;  %v463_v25 = vmul.f32 %v2126_v34, %v2337_v29  ;;  %v464_v37 = vmul.f32 %v2129_v35, %v2337_v29 }
  0xe3   : > { %v621_v29 = vmul.f32 %v2100_v21, %v2636_v14  ;;  %v687_v44 = vadd.f32 %v623_v61, %v459_v60  ;;  %v688_v46 = vadd.f32 %v624_v63, %v460_v13 }
  0xe5   : > { %v685_v49 = vadd.f32 %v621_v29, %v457_v56  ;;  %v2637_v56 = vld [vmem:[#allocation6_spill] sm:$0xff] }
  0xe6   : > { %v527_v57 = vpop.permute.xlu1 %526  ;;  %v629_v6 = vmul.f32 %v2100_v21, %v2637_v56  ;;  %v630_v60 = vmul.f32 %v2102_v22, %v2637_v56  ;;  %v631_v13 = vmul.f32 %v2104_v26, %v2637_v56 }
  0xe7   : > { %v625_v24 = vmul.f32 %v2100_v21, %v527_v57  ;;  %v626_v3 = vmul.f32 %v2102_v22, %v527_v57  ;;  %v627_v41 = vmul.f32 %v2104_v26, %v527_v57  ;;  %v628_v7 = vmul.f32 %v2106_v27, %v527_v57  ;;  %v783_v57 = vpop.permute.xlu0 %782 }
  0xe9   : > { %v689_v19 = vadd.f32 %v625_v24, %v461_v9  ;;  %v690_v17 = vadd.f32 %v626_v3, %v462_v32  ;;  %v691_v28 = vadd.f32 %v627_v41, %v463_v25  ;;  %v692_v18 = vadd.f32 %v628_v7, %v464_v37 }
  0xeb   : > { %v768_v43 = vpop.permute.xlu1 %767  ;;  %v850_v59 = vadd.f32 %v783_v57, %v690_v17 }
  0xec   : > { %v837_v42 = vadd.f32 %v768_v43, %v677_v40  ;;  %v838_v54 = vadd.f32 %v768_v43, %v678_v16  ;;  %v839_v33 = vadd.f32 %v768_v43, %v679_v52  ;;  %v840_v53 = vadd.f32 %v768_v43, %v680_v48 }
  0xed   : > { %v852_v40 = vadd.f32 %v783_v57, %v692_v18  ;;  %v849_v16 = vadd.f32 %v783_v57, %v689_v19  ;;  %v851_v52 = vadd.f32 %v783_v57, %v691_v28 }
  0xee   : > { %v902_v62 = vmax.f32 %v838_v54, 0.0  ;;  %v904_v38 = vmax.f32 %v840_v53, 0.0  ;;  %v901_v10 = vmax.f32 %v837_v42, 0.0  ;;  %v903_v4 = vmax.f32 %v839_v33, 0.0 }
  0xef   : > { %v2367_v23 = vpop.permute.xlu1 %362  ;;  %v914_v53 = vmax.f32 %v850_v59, 0.0 }
  0xf0   : > { %v966_v51 = vpack.c.bf16 %v906_v2, %v902_v62  ;;  %v968_v8 = vpack.c.bf16 %v908_v11, %v904_v38  ;;  %v965_v1 = vpack.c.bf16 %v905_v58, %v901_v10  ;;  %v967_v12 = vpack.c.bf16 %v907_v45, %v903_v4 }
  0xf1   : > { %v916_v62 = vmax.f32 %v852_v40, 0.0  ;;  %v913_v38 = vmax.f32 %v849_v16, 0.0  ;;  %v915_v10 = vmax.f32 %v851_v52, 0.0  ;;  %v465_v19 = vmul.f32 %v2114_v30, %v2367_v23 }
  0xf2   : > { %1133 = vmatprep.subr.bf16.mxu0 %v966_v51  ;;  %1246 = vmatprep.subr.bf16.mxu1 %v968_v8  ;;  %v466_v17 = vmul.f32 %v2117_v31, %v2367_v23  ;;  %v467_v28 = vmul.f32 %v2126_v34, %v2367_v23  ;;  %v468_v18 = vmul.f32 %v2129_v35, %v2367_v23 }
  0xf3   : > { %v368_v20 = vpop.permute.xlu1 %367  ;;  %1134 = vmatpush1.bf16.msra.mxu0 %v965_v1  ;;  %1247 = vmatpush1.bf16.msra.mxu1 %v967_v12  ;;  %v693_v16 = vadd.f32 %v629_v6, %v465_v19 }
  0xf4   : > { %v469_v12 = vmul.f32 %v2114_v30, %v368_v20  ;;  %v470_v24 = vmul.f32 %v2117_v31, %v368_v20  ;;  %v471_v3 = vmul.f32 %v2126_v34, %v368_v20  ;;  %v472_v41 = vmul.f32 %v2129_v35, %v368_v20 }
  0xf5   : > { %v632_v20 = vmul.f32 %v2106_v27, %v2637_v56  ;;  %v694_v52 = vadd.f32 %v630_v60, %v466_v17 }
  0xf8   : > { %v535_v15 = vpop.permute.xlu1 %534 }
  0xf9   : > { %v633_v4 = vmul.f32 %v2100_v21, %v535_v15  ;;  %v634_v2 = vmul.f32 %v2102_v22, %v535_v15  ;;  %v635_v11 = vmul.f32 %v2104_v26, %v535_v15  ;;  %v636_v58 = vmul.f32 %v2106_v27, %v535_v15  ;;  %v793_v15 = vpop.permute.xlu0 %792 }
  0xfb   : > { %v697_v9 = vadd.f32 %v633_v4, %v469_v12  ;;  %v698_v32 = vadd.f32 %v634_v2, %v470_v24  ;;  %v699_v25 = vadd.f32 %v635_v11, %v471_v3  ;;  %v700_v37 = vadd.f32 %v636_v58, %v472_v41 }
  0xfd   : > { %v778_v55 = vpop.permute.xlu1 %777  ;;  %v858_v29 = vadd.f32 %v793_v15, %v698_v32  ;;  %v860_v50 = vadd.f32 %v793_v15, %v700_v37  ;;  %v857_v61 = vadd.f32 %v793_v15, %v697_v9  ;;  %v859_v63 = vadd.f32 %v793_v15, %v699_v25 }
  0xfe   : > { %v845_v48 = vadd.f32 %v778_v55, %v685_v49  ;;  %v846_v43 = vadd.f32 %v778_v55, %v686_v0  ;;  %v847_v47 = vadd.f32 %v778_v55, %v687_v44  ;;  %v848_v36 = vadd.f32 %v778_v55, %v688_v46  ;;  %v2638_v46 = vld [vmem:[#allocation7_spill] sm:$0xff] }
  0xff   : > { %v637_v55 = vmul.f32 %v2100_v21, %v2638_v46  ;;  %v638_v59 = vmul.f32 %v2102_v22, %v2638_v46  ;;  %v639_v23 = vmul.f32 %v2104_v26, %v2638_v46  ;;  %v640_v40 = vmul.f32 %v2106_v27, %v2638_v46  ;;  %v1804_v46 = vld [vmem:[%s2618_s3] sm:$0xff]  }
 0x100   : > { %v910_v5 = vmax.f32 %v846_v43, 0.0  ;;  %v912_v39 = vmax.f32 %v848_v36, 0.0  ;;  %v909_v42 = vmax.f32 %v845_v48, 0.0  ;;  %v911_v54 = vmax.f32 %v847_v47, 0.0 }
 0x101   : > { %v373_v33 = vpop.permute.xlu1 %372  ;;  %v695_v48 = vadd.f32 %v631_v13, %v467_v28  ;;  %v696_v43 = vadd.f32 %v632_v20, %v468_v18  ;;  %v922_v47 = vmax.f32 %v858_v29, 0.0  ;;  %v924_v36 = vmax.f32 %v860_v50, 0.0 }
 0x102   : > { %v970_v45 = vpack.c.bf16 %v914_v53, %v910_v5  ;;  %v972_v51 = vpack.c.bf16 %v916_v62, %v912_v39  ;;  %v969_v8 = vpack.c.bf16 %v913_v38, %v909_v42  ;;  %v971_v1 = vpack.c.bf16 %v915_v10, %v911_v54 }
 0x103   : > { %v473_v57 = vmul.f32 %v2114_v30, %v373_v33  ;;  %v474_v49 = vmul.f32 %v2117_v31, %v373_v33  ;;  %v475_v0 = vmul.f32 %v2126_v34, %v373_v33  ;;  %v476_v44 = vmul.f32 %v2129_v35, %v373_v33 }
 0x104   : > { %1135 = vmatprep.subr.bf16.mxu0 %v970_v45  ;;  %1248 = vmatprep.subr.bf16.mxu1 %v972_v51  ;;  %v921_v5 = vmax.f32 %v857_v61, 0.0  ;;  %v923_v39 = vmax.f32 %v859_v63, 0.0 }
 0x105   : > { %v378_v7 = vpop.permute.xlu1 %377  ;;  %1136 = vmatpush1.bf16.msra.mxu0 %v969_v8  ;;  %1249 = vmatpush1.bf16.msra.mxu1 %v971_v1  ;;  %v701_v54 = vadd.f32 %v637_v55, %v473_v57  ;;  %v702_v33 = vadd.f32 %v638_v59, %v474_v49  ;;  %v703_v53 = vadd.f32 %v639_v23, %v475_v0  ;;  %v2639_v55 = vmov 0   ;;  %v1805_v59 = vld [vmem:[%s2618_s3 + $0x8] sm:$0xff]   ;;  %v1806_v23 = vld [vmem:[%s2618_s3 + $0x10] sm:$0xff]  }
 0x106   : > { %v704_v62 = vadd.f32 %v640_v40, %v476_v44  ;;  %v477_v3 = vmul.f32 %v2114_v30, %v378_v7  ;;  %v478_v41 = vmul.f32 %v2117_v31, %v378_v7  ;;  %v479_v9 = vmul.f32 %v2126_v34, %v378_v7  ;;  %v1807_v40 = vld [vmem:[%s2618_s3 + $0x18] sm:$0xff]  }
 0x107   : > { %v480_v32 = vmul.f32 %v2129_v35, %v378_v7 }
 0x10a   : > { %v543_v14 = vpop.permute.xlu1 %542 }
 0x10b   : > { %v641_v11 = vmul.f32 %v2100_v21, %v543_v14  ;;  %v642_v58 = vmul.f32 %v2102_v22, %v543_v14  ;;  %v643_v45 = vmul.f32 %v2104_v26, %v543_v14  ;;  %v644_v51 = vmul.f32 %v2106_v27, %v543_v14 }
 0x10d   : > { %v705_v13 = vadd.f32 %v641_v11, %v477_v3  ;;  %v706_v20 = vadd.f32 %v642_v58, %v478_v41  ;;  %v707_v15 = vadd.f32 %v643_v45, %v479_v9  ;;  %v708_v19 = vadd.f32 %v644_v51, %v480_v32 }
 0x10f   : > { %v788_v42 = vpop.permute.xlu1 %787 }
 0x110   : > { %v853_v38 = vadd.f32 %v788_v42, %v693_v16  ;;  %v854_v10 = vadd.f32 %v788_v42, %v694_v52  ;;  %v855_v4 = vadd.f32 %v788_v42, %v695_v48  ;;  %v856_v2 = vadd.f32 %v788_v42, %v696_v43  ;;  %v1808_v16 = vld [vmem:[%s2618_s3 + $0x20] sm:$0xff]   ;;  %v1809_v52 = vld [vmem:[%s2618_s3 + $0x28] sm:$0xff]   ;;  %v1810_v48 = vld [vmem:[%s2618_s3 + $0x30] sm:$0xff]  }
 0x111   : > { %v1811_v43 = vld [vmem:[%s2618_s3 + $0x38] sm:$0xff]  }
 0x112   : > { %v918_v8 = vmax.f32 %v854_v10, 0.0  ;;  %v920_v1 = vmax.f32 %v856_v2, 0.0  ;;  %v917_v12 = vmax.f32 %v853_v38, 0.0  ;;  %v919_v24 = vmax.f32 %v855_v4, 0.0 }
 0x113   : > { %v798_v25 = vpop.permute.xlu1 %797 }
 0x114   : > { %v861_v21 = vadd.f32 %v798_v25, %v701_v54  ;;  %v862_v37 = vadd.f32 %v798_v25, %v702_v33  ;;  %v863_v22 = vadd.f32 %v798_v25, %v703_v53  ;;  %v864_v56 = vadd.f32 %v798_v25, %v704_v62 }
 0x115   : > { %v974_v26 = vpack.c.bf16 %v922_v47, %v918_v8  ;;  %v976_v6 = vpack.c.bf16 %v924_v36, %v920_v1  ;;  %v973_v27 = vpack.c.bf16 %v921_v5, %v917_v12  ;;  %v975_v60 = vpack.c.bf16 %v923_v39, %v919_v24  ;;  %v1000_v47 = vpop.permute.xlu0 %999 }
 0x116   : > { %v926_v7 = vmax.f32 %v862_v37, 0.0  ;;  %v928_v28 = vmax.f32 %v864_v56, 0.0  ;;  %v925_v18 = vmax.f32 %v861_v21, 0.0  ;;  %v927_v14 = vmax.f32 %v863_v22, 0.0 }
 0x117   : > { %1137 = vmatprep.subr.bf16.mxu0 %v974_v26  ;;  %1250 = vmatprep.subr.bf16.mxu1 %v976_v6  ;;  %v803_v30 = vpop.permute.xlu1 %802 }
 0x118   : > { %v865_v31 = vadd.f32 %v803_v30, %v705_v13  ;;  %v866_v34 = vadd.f32 %v803_v30, %v706_v20  ;;  %v867_v17 = vadd.f32 %v803_v30, %v707_v15  ;;  %v868_v35 = vadd.f32 %v803_v30, %v708_v19  ;;  %1138 = vmatpush1.bf16.msra.mxu0 %v973_v27 }
 0x119   : > { %1251 = vmatpush1.bf16.msra.mxu1 %v975_v60  ;;  %v1010_v5 = vpop.permute.xlu0 %1009 }
 0x11a   : > { %v930_v29 = vmax.f32 %v866_v34, 0.0  ;;  %v932_v50 = vmax.f32 %v868_v35, 0.0  ;;  %v929_v61 = vmax.f32 %v865_v31, 0.0  ;;  %v931_v63 = vmax.f32 %v867_v17, 0.0 }
 0x11b   : > { %v1005_v36 = vpop.permute.xlu1 %1004 }
 0x11c   : > { %v978_v57 = vpack.c.bf16 %v930_v29, %v926_v7  ;;  %v980_v49 = vpack.c.bf16 %v932_v50, %v928_v28  ;;  %v977_v0 = vpack.c.bf16 %v929_v61, %v925_v18  ;;  %v979_v44 = vpack.c.bf16 %v931_v63, %v927_v14 }
 0x11d   : > { %v1434_v42 = vpop.permute.xlu0 %1433 }
 0x11e   : > { %1139 = vmatprep.subr.bf16.mxu0 %v978_v57  ;;  %1252 = vmatprep.subr.bf16.mxu1 %v980_v49 }
 0x11f   : > { %1140 = vmatpush1.bf16.msra.mxu0 %v977_v0  ;;  %1253 = vmatpush1.bf16.msra.mxu1 %v979_v44  ;;  %v2479_v39 = vpop.permute.xlu1 %1014 }
 0x121   : > { %v2481_v33 = vpop.permute.xlu0 %1019 }
 0x122   : > { %1158 = vmatmul.mubr.bf16.vlgmr.msra.gmra.mrb[0].mxu0 %v1804_v46  ;;  %1271 = vmatmul.mubr.bf16.vlgmr.msra.gmra.mrb[0].mxu1 %v1804_v46 }
 0x123   : > { %1167 = vmatprep.mubr.bf16.mxu0 %v2639_v55  ;;  %1280 = vmatprep.mubr.bf16.mxu1 %v2639_v55  ;;  %v1439_v54 = vpop.permute.xlu1 %1438 }
 0x125   : > { %v2485_v62 = vpop.permute.xlu0 %1024 }
 0x127   : > { %v2483_v53 = vpop.permute.xlu1 %1443 }
 0x129   : > { %v2489_v10 = vpop.permute.xlu0 %1029 }
 0x12a   : > { %1168 = vmatmul.mubr.bf16.gmra.mrb[4].mxu0 %v1805_v59  ;;  %1281 = vmatmul.mubr.bf16.gmra.mrb[4].mxu1 %v1805_v59 }
 0x12b   : > { %1177 = vmatprep.mubr.bf16.mxu0 %v2639_v55  ;;  %1290 = vmatprep.mubr.bf16.mxu1 %v2639_v55  ;;  %v2487_v38 = vpop.permute.xlu1 %1448 }
 0x12d   : > { %v2493_v2 = vpop.permute.xlu0 %1034 }
 0x12f   : > { %v2491_v4 = vpop.permute.xlu1 %1453 }
 0x131   : > { %v2497_v58 = vpop.permute.xlu0 %1039 }
 0x132   : > { %1178 = vmatmul.mubr.bf16.gmra.mrb[8].mxu0 %v1806_v23  ;;  %1291 = vmatmul.mubr.bf16.gmra.mrb[8].mxu1 %v1806_v23 }
 0x133   : > { %1187 = vmatprep.mubr.bf16.mxu0 %v2639_v55  ;;  %1300 = vmatprep.mubr.bf16.mxu1 %v2639_v55  ;;  %v2495_v11 = vpop.permute.xlu1 %1458 }
 0x135   : > { %v2501_v34 = vpop.permute.xlu0 %1044 }
 0x137   : > { %v2499_v45 = vpop.permute.xlu1 %1463 }
 0x13a   : > { %1188 = vmatmul.mubr.bf16.gmra.mrb[12].mxu0 %v1807_v40  ;;  %1301 = vmatmul.mubr.bf16.gmra.mrb[12].mxu1 %v1807_v40 }
 0x13b   : > { %1197 = vmatprep.mubr.bf16.mxu0 %v2639_v55  ;;  %1310 = vmatprep.mubr.bf16.mxu1 %v2639_v55  ;;  %v2503_v17 = vpop.permute.xlu1 %1468 }
 0x142   : > { %1198 = vmatmul.mubr.bf16.gmra.mrb[16].mxu0 %v1808_v16  ;;  %1311 = vmatmul.mubr.bf16.gmra.mrb[16].mxu1 %v1808_v16 }
 0x143   : > { %1207 = vmatprep.mubr.bf16.mxu0 %v2639_v55  ;;  %1320 = vmatprep.mubr.bf16.mxu1 %v2639_v55 }
 0x14a   : > { %1208 = vmatmul.mubr.bf16.gmra.mrb[20].mxu0 %v1809_v52  ;;  %1321 = vmatmul.mubr.bf16.gmra.mrb[20].mxu1 %v1809_v52 }
 0x14b   : > { %1217 = vmatprep.mubr.bf16.mxu0 %v2639_v55  ;;  %1330 = vmatprep.mubr.bf16.mxu1 %v2639_v55 }
 0x152   : > { %1218 = vmatmul.mubr.bf16.gmra.mrb[24].mxu0 %v1810_v48  ;;  %1331 = vmatmul.mubr.bf16.gmra.mrb[24].mxu1 %v1810_v48 }
 0x153   : > { %1227 = vmatprep.mubr.bf16.mxu0 %v2639_v55  ;;  %1340 = vmatprep.mubr.bf16.mxu1 %v2639_v55 }
 0x15a   : > { %1228 = vmatmul.mubr.bf16.gmra.mrb[28].mxu0 %v1811_v43  ;;  %1341 = vmatmul.mubr.bf16.gmra.mrb[28].mxu1 %v1811_v43 }
 0x1f5   : > { %v1159_v51 = vpop.f32.mrb[0].mxu0  ;;  %v1272_v8 = vpop.f32.mrb[0].mxu1 }
 0x1f6   : > { %v1160_v1 = vadd.f32 %v1159_v51, %v1000_v47  ;;  %v1273_v12 = vadd.f32 %v1272_v8, %v1000_v47  ;;  %v1161_v24 = vpop.f32.mrb[1].mxu0  ;;  %v1274_v3 = vpop.f32.mrb[1].mxu1 }
 0x1f7   : > { %v1162_v41 = vadd.f32 %v1161_v24, %v1000_v47  ;;  %v1275_v9 = vadd.f32 %v1274_v3, %v1000_v47  ;;  %v1163_v32 = vpop.f32.mrb[2].mxu0  ;;  %v1276_v25 = vpop.f32.mrb[2].mxu1 }
 0x1f8   : > { %v1351_v21 = vmax.f32 %v1160_v1, 0.0  ;;  %v1353_v37 = vmax.f32 %v1273_v12, 0.0  ;;  %v1164_v22 = vadd.f32 %v1163_v32, %v1005_v36  ;;  %v1277_v56 = vadd.f32 %v1276_v25, %v1005_v36  ;;  %v1165_v26 = vpop.f32.mrb[3].mxu0  ;;  %v1278_v6 = vpop.f32.mrb[3].mxu1 }
 0x1f9   : > { %v1352_v27 = vmax.f32 %v1162_v41, 0.0  ;;  %v1354_v60 = vmax.f32 %v1275_v9, 0.0  ;;  %v1166_v13 = vadd.f32 %v1165_v26, %v1005_v36  ;;  %v1279_v20 = vadd.f32 %v1278_v6, %v1005_v36  ;;  %v2515_v26 = vpop.permute.xlu1 %1473 }
 0x1fa   : > { %v1355_v15 = vmax.f32 %v1164_v22, 0.0  ;;  %v1357_v19 = vmax.f32 %v1277_v56, 0.0  ;;  %v1511_v35 = vmul.f32 %v1434_v42, %v1351_v21  ;;  %v1513_v7 = vmul.f32 %v1434_v42, %v1353_v37  ;;  %v2513_v56 = vpop.permute.xlu0 %1049 }
 0x1fb   : > { %v1356_v30 = vmax.f32 %v1166_v13, 0.0  ;;  %v1358_v31 = vmax.f32 %v1279_v20, 0.0  ;;  %v1512_v14 = vmul.f32 %v1434_v42, %v1352_v27  ;;  %v1514_v29 = vmul.f32 %v1434_v42, %v1354_v60 }
 0x1fc   : > { %v1515_v28 = vmul.f32 %v1439_v54, %v1355_v15  ;;  %v1517_v18 = vmul.f32 %v1439_v54, %v1357_v19 }
 0x1fd   : > { %v1516_v50 = vmul.f32 %v1439_v54, %v1356_v30  ;;  %v1518_v61 = vmul.f32 %v1439_v54, %v1358_v31  ;;  %v1169_v63 = vpop.f32.mrb[4].mxu0  ;;  %v1282_v57 = vpop.f32.mrb[4].mxu1 }
 0x1fe   : > { %v1575_v49 = vadd.f32 %v1515_v28, %v1511_v35  ;;  %v1617_v0 = vadd.f32 %v1517_v18, %v1513_v7  ;;  %v1170_v44 = vadd.f32 %v1169_v63, %v1010_v5  ;;  %v1283_v46 = vadd.f32 %v1282_v57, %v1010_v5  ;;  %v1171_v55 = vpop.f32.mrb[5].mxu0  ;;  %v1284_v59 = vpop.f32.mrb[5].mxu1 }
 0x1ff   : > { %v1596_v23 = vadd.f32 %v1516_v50, %v1512_v14  ;;  %v1638_v40 = vadd.f32 %v1518_v61, %v1514_v29  ;;  %v1172_v16 = vadd.f32 %v1171_v55, %v1010_v5  ;;  %v1285_v52 = vadd.f32 %v1284_v59, %v1010_v5  ;;  %v1173_v48 = vpop.f32.mrb[6].mxu0  ;;  %v1286_v43 = vpop.f32.mrb[6].mxu1 }
 0x200   : > { %v1359_v47 = vmax.f32 %v1170_v44, 0.0  ;;  %v1361_v36 = vmax.f32 %v1283_v46, 0.0  ;;  %v1174_v42 = vadd.f32 %v1173_v48, %v2479_v39  ;;  %v1287_v54 = vadd.f32 %v1286_v43, %v2479_v39  ;;  %v1175_v51 = vpop.f32.mrb[7].mxu0  ;;  %v1288_v8 = vpop.f32.mrb[7].mxu1 }
 0x201   : > { %v1360_v1 = vmax.f32 %v1172_v16, 0.0  ;;  %v1362_v12 = vmax.f32 %v1285_v52, 0.0  ;;  %v1176_v24 = vadd.f32 %v1175_v51, %v2479_v39  ;;  %v1289_v3 = vadd.f32 %v1288_v8, %v2479_v39  ;;  %v2533_v8 = vpop.permute.xlu0 %1054 }
 0x202   : > { %v1519_v41 = vmul.f32 %v2483_v53, %v1359_v47  ;;  %v1521_v5 = vmul.f32 %v2483_v53, %v1361_v36  ;;  %v1363_v9 = vmax.f32 %v1174_v42, 0.0  ;;  %v1365_v32 = vmax.f32 %v1287_v54, 0.0 }
 0x203   : > { %v1520_v25 = vmul.f32 %v2483_v53, %v1360_v1  ;;  %v1522_v21 = vmul.f32 %v2483_v53, %v1362_v12  ;;  %v1364_v37 = vmax.f32 %v1176_v24, 0.0  ;;  %v1366_v22 = vmax.f32 %v1289_v3, 0.0  ;;  %v2535_v1 = vpop.permute.xlu1 %1478 }
 0x204   : > { %v1576_v6 = vadd.f32 %v1575_v49, %v1519_v41  ;;  %v1618_v27 = vadd.f32 %v1617_v0, %v1521_v5  ;;  %v1523_v39 = vmul.f32 %v2487_v38, %v1363_v9  ;;  %v1525_v60 = vmul.f32 %v2487_v38, %v1365_v32 }
 0x205   : > { %v1597_v13 = vadd.f32 %v1596_v23, %v1520_v25  ;;  %v1639_v20 = vadd.f32 %v1638_v40, %v1522_v21  ;;  %v1524_v15 = vmul.f32 %v2487_v38, %v1364_v37  ;;  %v1526_v19 = vmul.f32 %v2487_v38, %v1366_v22  ;;  %v1179_v30 = vpop.f32.mrb[8].mxu0  ;;  %v1292_v53 = vpop.f32.mrb[8].mxu1 }
 0x206   : > { %v1577_v31 = vadd.f32 %v1576_v6, %v1523_v39  ;;  %v1619_v35 = vadd.f32 %v1618_v27, %v1525_v60  ;;  %v1180_v7 = vadd.f32 %v1179_v30, %v2481_v33  ;;  %v1293_v28 = vadd.f32 %v1292_v53, %v2481_v33  ;;  %v1181_v18 = vpop.f32.mrb[9].mxu0  ;;  %v1294_v14 = vpop.f32.mrb[9].mxu1 }
 0x207   : > { %v1598_v29 = vadd.f32 %v1597_v13, %v1524_v15  ;;  %v1640_v50 = vadd.f32 %v1639_v20, %v1526_v19  ;;  %v1182_v61 = vadd.f32 %v1181_v18, %v2481_v33  ;;  %v1295_v63 = vadd.f32 %v1294_v14, %v2481_v33  ;;  %v1183_v57 = vpop.f32.mrb[10].mxu0  ;;  %v1296_v49 = vpop.f32.mrb[10].mxu1 }
 0x208   : > { %v1367_v0 = vmax.f32 %v1180_v7, 0.0  ;;  %v1369_v38 = vmax.f32 %v1293_v28, 0.0  ;;  %v1184_v44 = vadd.f32 %v1183_v57, %v2485_v62  ;;  %v1297_v46 = vadd.f32 %v1296_v49, %v2485_v62  ;;  %v1185_v55 = vpop.f32.mrb[11].mxu0  ;;  %v1298_v59 = vpop.f32.mrb[11].mxu1 }
 0x209   : > { %v1368_v23 = vmax.f32 %v1182_v61, 0.0  ;;  %v1370_v40 = vmax.f32 %v1295_v63, 0.0  ;;  %v1186_v16 = vadd.f32 %v1185_v55, %v2485_v62  ;;  %v1299_v52 = vadd.f32 %v1298_v59, %v2485_v62  ;;  %v2555_v55 = vpop.permute.xlu1 %1483 }
 0x20a   : > { %v1527_v48 = vmul.f32 %v2491_v4, %v1367_v0  ;;  %v1529_v33 = vmul.f32 %v2491_v4, %v1369_v38  ;;  %v1371_v43 = vmax.f32 %v1184_v44, 0.0  ;;  %v1373_v47 = vmax.f32 %v1297_v46, 0.0  ;;  %v2553_v46 = vpop.permute.xlu0 %1059 }
 0x20b   : > { %v1528_v36 = vmul.f32 %v2491_v4, %v1368_v23  ;;  %v1530_v42 = vmul.f32 %v2491_v4, %v1370_v40  ;;  %v1372_v54 = vmax.f32 %v1186_v16, 0.0  ;;  %v1374_v51 = vmax.f32 %v1299_v52, 0.0 }
 0x20c   : > { %v1578_v12 = vadd.f32 %v1577_v31, %v1527_v48  ;;  %v1620_v24 = vadd.f32 %v1619_v35, %v1529_v33  ;;  %v1531_v62 = vmul.f32 %v2495_v11, %v1371_v43  ;;  %v1533_v3 = vmul.f32 %v2495_v11, %v1373_v47 }
 0x20d   : > { %v1599_v41 = vadd.f32 %v1598_v29, %v1528_v36  ;;  %v1641_v5 = vadd.f32 %v1640_v50, %v1530_v42  ;;  %v1532_v9 = vmul.f32 %v2495_v11, %v1372_v54  ;;  %v1534_v32 = vmul.f32 %v2495_v11, %v1374_v51  ;;  %v1189_v25 = vpop.f32.mrb[12].mxu0  ;;  %v1302_v4 = vpop.f32.mrb[12].mxu1 }
 0x20e   : > { %v1579_v21 = vadd.f32 %v1578_v12, %v1531_v62  ;;  %v1621_v37 = vadd.f32 %v1620_v24, %v1533_v3  ;;  %v1190_v22 = vadd.f32 %v1189_v25, %v2489_v10  ;;  %v1303_v6 = vadd.f32 %v1302_v4, %v2489_v10  ;;  %v1191_v27 = vpop.f32.mrb[13].mxu0  ;;  %v1304_v39 = vpop.f32.mrb[13].mxu1 }
 0x20f   : > { %v1600_v60 = vadd.f32 %v1599_v41, %v1532_v9  ;;  %v1642_v13 = vadd.f32 %v1641_v5, %v1534_v32  ;;  %v1192_v20 = vadd.f32 %v1191_v27, %v2489_v10  ;;  %v1305_v15 = vadd.f32 %v1304_v39, %v2489_v10  ;;  %v1193_v19 = vpop.f32.mrb[14].mxu0  ;;  %v1306_v30 = vpop.f32.mrb[14].mxu1 }
 0x210   : > { %v1375_v53 = vmax.f32 %v1190_v22, 0.0  ;;  %v1377_v11 = vmax.f32 %v1303_v6, 0.0  ;;  %v1194_v31 = vadd.f32 %v1193_v19, %v2493_v2  ;;  %v1307_v35 = vadd.f32 %v1306_v30, %v2493_v2  ;;  %v1195_v7 = vpop.f32.mrb[15].mxu0  ;;  %v1308_v28 = vpop.f32.mrb[15].mxu1 }
 0x211   : > { %v1376_v18 = vmax.f32 %v1192_v20, 0.0  ;;  %v1378_v14 = vmax.f32 %v1305_v15, 0.0  ;;  %v1196_v29 = vadd.f32 %v1195_v7, %v2493_v2  ;;  %v1309_v50 = vadd.f32 %v1308_v28, %v2493_v2 }
 0x212   : > { %v1535_v61 = vmul.f32 %v2499_v45, %v1375_v53  ;;  %v1537_v10 = vmul.f32 %v2499_v45, %v1377_v11  ;;  %v1379_v63 = vmax.f32 %v1194_v31, 0.0  ;;  %v1381_v57 = vmax.f32 %v1307_v35, 0.0  ;;  %v2573_v11 = vpop.permute.xlu0 %1064  ;;  %v1489_v31 = vpop.permute.xlu1 %1488 }
 0x213   : > { %v1536_v49 = vmul.f32 %v2499_v45, %v1376_v18  ;;  %v1538_v0 = vmul.f32 %v2499_v45, %v1378_v14  ;;  %v1380_v38 = vmax.f32 %v1196_v29, 0.0  ;;  %v1382_v44 = vmax.f32 %v1309_v50, 0.0 }
 0x214   : > { %v1580_v59 = vadd.f32 %v1579_v21, %v1535_v61  ;;  %v1622_v23 = vadd.f32 %v1621_v37, %v1537_v10  ;;  %v1539_v2 = vmul.f32 %v2503_v17, %v1379_v63  ;;  %v1541_v40 = vmul.f32 %v2503_v17, %v1381_v57 }
 0x215   : > { %v1601_v16 = vadd.f32 %v1600_v60, %v1536_v49  ;;  %v1643_v52 = vadd.f32 %v1642_v13, %v1538_v0  ;;  %v1540_v48 = vmul.f32 %v2503_v17, %v1380_v38  ;;  %v1542_v33 = vmul.f32 %v2503_v17, %v1382_v44  ;;  %v1199_v43 = vpop.f32.mrb[16].mxu0  ;;  %v1312_v45 = vpop.f32.mrb[16].mxu1 }
 0x216   : > { %v1581_v47 = vadd.f32 %v1580_v59, %v1539_v2  ;;  %v1623_v36 = vadd.f32 %v1622_v23, %v1541_v40  ;;  %v1200_v42 = vadd.f32 %v1199_v43, %v2497_v58  ;;  %v1313_v54 = vadd.f32 %v1312_v45, %v2497_v58  ;;  %v1201_v51 = vpop.f32.mrb[17].mxu0  ;;  %v1314_v12 = vpop.f32.mrb[17].mxu1 }
 0x217   : > { %v1602_v24 = vadd.f32 %v1601_v16, %v1540_v48  ;;  %v1644_v62 = vadd.f32 %v1643_v52, %v1542_v33  ;;  %v1202_v3 = vadd.f32 %v1201_v51, %v2497_v58  ;;  %v1315_v41 = vadd.f32 %v1314_v12, %v2497_v58  ;;  %v1203_v5 = vpop.f32.mrb[18].mxu0  ;;  %v1316_v9 = vpop.f32.mrb[18].mxu1 }
 0x218   : > { %v1383_v32 = vmax.f32 %v1200_v42, 0.0  ;;  %v1385_v17 = vmax.f32 %v1313_v54, 0.0  ;;  %v1204_v25 = vadd.f32 %v1203_v5, %v2501_v34  ;;  %v1317_v4 = vadd.f32 %v1316_v9, %v2501_v34  ;;  %v1205_v21 = vpop.f32.mrb[19].mxu0  ;;  %v1318_v37 = vpop.f32.mrb[19].mxu1 }
 0x219   : > { %v1384_v22 = vmax.f32 %v1202_v3, 0.0  ;;  %v1386_v6 = vmax.f32 %v1315_v41, 0.0  ;;  %v1206_v27 = vadd.f32 %v1205_v21, %v2501_v34  ;;  %v1319_v39 = vadd.f32 %v1318_v37, %v2501_v34  ;;  %v2591_v9 = vpop.permute.xlu0 %1069 }
 0x21a   : > { %v1543_v60 = vmul.f32 %v2515_v26, %v1383_v32  ;;  %v1545_v58 = vmul.f32 %v2515_v26, %v1385_v17  ;;  %v1387_v13 = vmax.f32 %v1204_v25, 0.0  ;;  %v1389_v20 = vmax.f32 %v1317_v4, 0.0  ;;  %v1494_v32 = vpop.permute.xlu1 %1493 }
 0x21b   : > { %v1544_v15 = vmul.f32 %v2515_v26, %v1384_v22  ;;  %v1546_v19 = vmul.f32 %v2515_v26, %v1386_v6  ;;  %v1388_v30 = vmax.f32 %v1206_v27, 0.0  ;;  %v1390_v53 = vmax.f32 %v1319_v39, 0.0 }
 0x21c   : > { %v1582_v35 = vadd.f32 %v1581_v47, %v1543_v60  ;;  %v1624_v7 = vadd.f32 %v1623_v36, %v1545_v58  ;;  %v1547_v28 = vmul.f32 %v2535_v1, %v1387_v13  ;;  %v1549_v34 = vmul.f32 %v2535_v1, %v1389_v20 }
 0x21d   : > { %v1603_v18 = vadd.f32 %v1602_v24, %v1544_v15  ;;  %v1645_v14 = vadd.f32 %v1644_v62, %v1546_v19  ;;  %v1548_v29 = vmul.f32 %v2535_v1, %v1388_v30  ;;  %v1550_v50 = vmul.f32 %v2535_v1, %v1390_v53  ;;  %v1209_v61 = vpop.f32.mrb[20].mxu0  ;;  %v1322_v10 = vpop.f32.mrb[20].mxu1 }
 0x21e   : > { %v1583_v26 = vadd.f32 %v1582_v35, %v1547_v28  ;;  %v1625_v63 = vadd.f32 %v1624_v7, %v1549_v34  ;;  %v1210_v57 = vadd.f32 %v1209_v61, %v2513_v56  ;;  %v1323_v49 = vadd.f32 %v1322_v10, %v2513_v56  ;;  %v1211_v0 = vpop.f32.mrb[21].mxu0  ;;  %v1324_v38 = vpop.f32.mrb[21].mxu1 }
 0x21f   : > { %v1604_v44 = vadd.f32 %v1603_v18, %v1548_v29  ;;  %v1646_v59 = vadd.f32 %v1645_v14, %v1550_v50  ;;  %v1212_v23 = vadd.f32 %v1211_v0, %v2513_v56  ;;  %v1325_v2 = vadd.f32 %v1324_v38, %v2513_v56  ;;  %v1213_v40 = vpop.f32.mrb[22].mxu0  ;;  %v1326_v16 = vpop.f32.mrb[22].mxu1 }
 0x220   : > { %v1391_v52 = vmax.f32 %v1210_v57, 0.0  ;;  %v1393_v1 = vmax.f32 %v1323_v49, 0.0  ;;  %v1214_v48 = vadd.f32 %v1213_v40, %v2533_v8  ;;  %v1327_v33 = vadd.f32 %v1326_v16, %v2533_v8  ;;  %v1215_v43 = vpop.f32.mrb[23].mxu0  ;;  %v1328_v45 = vpop.f32.mrb[23].mxu1 }
 0x221   : > { %v1392_v47 = vmax.f32 %v1212_v23, 0.0  ;;  %v1394_v36 = vmax.f32 %v1325_v2, 0.0  ;;  %v1216_v42 = vadd.f32 %v1215_v43, %v2533_v8  ;;  %v1329_v54 = vadd.f32 %v1328_v45, %v2533_v8  ;;  %v1075_v38 = vpop.permute.xlu0 %1074 }
 0x222   : > { %v1551_v51 = vmul.f32 %v2555_v55, %v1391_v52  ;;  %v1553_v56 = vmul.f32 %v2555_v55, %v1393_v1  ;;  %v1395_v12 = vmax.f32 %v1214_v48, 0.0  ;;  %v1397_v24 = vmax.f32 %v1327_v33, 0.0 }
 0x223   : > { %v1552_v62 = vmul.f32 %v2555_v55, %v1392_v47  ;;  %v1554_v3 = vmul.f32 %v2555_v55, %v1394_v36  ;;  %v1396_v41 = vmax.f32 %v1216_v42, 0.0  ;;  %v1398_v5 = vmax.f32 %v1329_v54, 0.0 }
 0x224   : > { %v1584_v17 = vadd.f32 %v1583_v26, %v1551_v51  ;;  %v1626_v25 = vadd.f32 %v1625_v63, %v1553_v56  ;;  %v1555_v4 = vmul.f32 %v1489_v31, %v1395_v12  ;;  %v1557_v21 = vmul.f32 %v1489_v31, %v1397_v24 }
 0x225   : > { %v1605_v8 = vadd.f32 %v1604_v44, %v1552_v62  ;;  %v1647_v37 = vadd.f32 %v1646_v59, %v1554_v3  ;;  %v1556_v22 = vmul.f32 %v1489_v31, %v1396_v41  ;;  %v1558_v6 = vmul.f32 %v1489_v31, %v1398_v5  ;;  %v1219_v27 = vpop.f32.mrb[24].mxu0  ;;  %v1332_v39 = vpop.f32.mrb[24].mxu1 }
 0x226   : > { %v1585_v60 = vadd.f32 %v1584_v17, %v1555_v4  ;;  %v1627_v58 = vadd.f32 %v1626_v25, %v1557_v21  ;;  %v1220_v13 = vadd.f32 %v1219_v27, %v2553_v46  ;;  %v1333_v55 = vadd.f32 %v1332_v39, %v2553_v46  ;;  %v1221_v20 = vpop.f32.mrb[25].mxu0  ;;  %v1334_v15 = vpop.f32.mrb[25].mxu1 }
 0x227   : > { %v1606_v19 = vadd.f32 %v1605_v8, %v1556_v22  ;;  %v1648_v30 = vadd.f32 %v1647_v37, %v1558_v6  ;;  %v1222_v53 = vadd.f32 %v1221_v20, %v2553_v46  ;;  %v1335_v35 = vadd.f32 %v1334_v15, %v2553_v46  ;;  %v1223_v7 = vpop.f32.mrb[26].mxu0  ;;  %v1336_v28 = vpop.f32.mrb[26].mxu1 }
 0x228   : > { %v1399_v34 = vmax.f32 %v1220_v13, 0.0  ;;  %v1401_v31 = vmax.f32 %v1333_v55, 0.0  ;;  %v1224_v18 = vadd.f32 %v1223_v7, %v2573_v11  ;;  %v1337_v14 = vadd.f32 %v1336_v28, %v2573_v11  ;;  %v1225_v29 = vpop.f32.mrb[27].mxu0  ;;  %v1338_v50 = vpop.f32.mrb[27].mxu1 }
 0x229   : > { %v1400_v61 = vmax.f32 %v1222_v53, 0.0  ;;  %v1402_v10 = vmax.f32 %v1335_v35, 0.0  ;;  %v1226_v26 = vadd.f32 %v1225_v29, %v2573_v11  ;;  %v1339_v63 = vadd.f32 %v1338_v50, %v2573_v11  ;;  %v1499_v44 = vpop.permute.xlu1 %1498  ;;  %v1504_v6 = vpop.permute.xlu0 %1503 }
 0x22a   : > { %v1559_v57 = vmul.f32 %v1494_v32, %v1399_v34  ;;  %v1561_v49 = vmul.f32 %v1494_v32, %v1401_v31  ;;  %v1403_v0 = vmax.f32 %v1224_v18, 0.0  ;;  %v1405_v46 = vmax.f32 %v1337_v14, 0.0 }
 0x22b   : > { %v1560_v59 = vmul.f32 %v1494_v32, %v1400_v61  ;;  %v1562_v23 = vmul.f32 %v1494_v32, %v1402_v10  ;;  %v1404_v2 = vmax.f32 %v1226_v26, 0.0  ;;  %v1406_v40 = vmax.f32 %v1339_v63, 0.0 }
 0x22c   : > { %v1586_v16 = vadd.f32 %v1585_v60, %v1559_v57  ;;  %v1628_v52 = vadd.f32 %v1627_v58, %v1561_v49  ;;  %v1563_v1 = vmul.f32 %v1499_v44, %v1403_v0  ;;  %v1565_v48 = vmul.f32 %v1499_v44, %v1405_v46 }
 0x22d   : > { %v1607_v33 = vadd.f32 %v1606_v19, %v1560_v59  ;;  %v1649_v43 = vadd.f32 %v1648_v30, %v1562_v23  ;;  %v1564_v45 = vmul.f32 %v1499_v44, %v1404_v2  ;;  %v1566_v47 = vmul.f32 %v1499_v44, %v1406_v40  ;;  %v1229_v36 = vpop.f32.mrb[28].mxu0  ;;  %v1342_v11 = vpop.f32.mrb[28].mxu1 }
 0x22e   : > { %v1587_v42 = vadd.f32 %v1586_v16, %v1563_v1  ;;  %v1629_v54 = vadd.f32 %v1628_v52, %v1565_v48  ;;  %v1230_v51 = vadd.f32 %v1229_v36, %v2591_v9  ;;  %v1343_v56 = vadd.f32 %v1342_v11, %v2591_v9  ;;  %v1231_v12 = vpop.f32.mrb[29].mxu0  ;;  %v1344_v24 = vpop.f32.mrb[29].mxu1 }
 0x22f   : > { %v1608_v62 = vadd.f32 %v1607_v33, %v1564_v45  ;;  %v1650_v3 = vadd.f32 %v1649_v43, %v1566_v47  ;;  %v1232_v41 = vadd.f32 %v1231_v12, %v2591_v9  ;;  %v1345_v5 = vadd.f32 %v1344_v24, %v2591_v9  ;;  %v1233_v32 = vpop.f32.mrb[30].mxu0  ;;  %v1346_v17 = vpop.f32.mrb[30].mxu1  ;;  %v2640_v12 = vld [vmem:[#allocation5_spill] sm:$0xff] }
 0x230   : > { %v1407_v25 = vmax.f32 %v1230_v51, 0.0  ;;  %v1409_v4 = vmax.f32 %v1343_v56, 0.0  ;;  %v1234_v21 = vadd.f32 %v1233_v32, %v1075_v38  ;;  %v1347_v8 = vadd.f32 %v1346_v17, %v1075_v38  ;;  %v1235_v37 = vpop.f32.mrb[31].mxu0  ;;  %v1348_v22 = vpop.f32.mrb[31].mxu1 }
 0x231   : > { %v1408_v27 = vmax.f32 %v1232_v41, 0.0  ;;  %v1410_v39 = vmax.f32 %v1345_v5, 0.0  ;;  %v1236_v60 = vadd.f32 %v1235_v37, %v1075_v38  ;;  %v1349_v58 = vadd.f32 %v1348_v22, %v1075_v38  ;;  %v1509_v19 = vpop.permute.xlu1 %1508  ;;  %v1663_v45 = vpop.permute.xlu0 %1662 }
 0x232   : > { %v1567_v13 = vmul.f32 %v1504_v6, %v1407_v25  ;;  %v1569_v55 = vmul.f32 %v1504_v6, %v1409_v4  ;;  %v1411_v20 = vmax.f32 %v1234_v21, 0.0  ;;  %v1413_v15 = vmax.f32 %v1347_v8, 0.0  ;;  %v2641_v4 = vld [vmem:[#allocation3_spill] sm:$0xff] }
 0x233   : > { %v1568_v30 = vmul.f32 %v1504_v6, %v1408_v27  ;;  %v1570_v9 = vmul.f32 %v1504_v6, %v1410_v39  ;;  %v1412_v53 = vmax.f32 %v1236_v60, 0.0  ;;  %v1414_v35 = vmax.f32 %v1349_v58, 0.0 }
 0x234   : > { %v1588_v7 = vadd.f32 %v1587_v42, %v1567_v13  ;;  %v1630_v28 = vadd.f32 %v1629_v54, %v1569_v55  ;;  %v1571_v34 = vmul.f32 %v1509_v19, %v1411_v20  ;;  %v1573_v31 = vmul.f32 %v1509_v19, %v1413_v15 }
 0x235   : > { %v1609_v18 = vadd.f32 %v1608_v62, %v1568_v30  ;;  %v1651_v14 = vadd.f32 %v1650_v3, %v1570_v9  ;;  %v1572_v29 = vmul.f32 %v1509_v19, %v1412_v53  ;;  %v1574_v50 = vmul.f32 %v1509_v19, %v1414_v35 }
 0x236   : > { %v1589_v61 = vadd.f32 %v1588_v7, %v1571_v34  ;;  %v1631_v10 = vadd.f32 %v1630_v28, %v1573_v31  ;;  %v1822_v52 = vmov 1966171168   ;;  %v1668_v24 = vrot.slane %v1663_v45, %v2640_v12 }
 0x237   : > { %v1610_v26 = vadd.f32 %v1609_v18, %v1572_v29  ;;  %v1652_v63 = vadd.f32 %v1651_v14, %v1574_v50  ;;  %v1680_v1 = vunpack.c.l.s4 %v1822_v52  ;;  %v2642_v60 = vlaneseq }
 0x238   : > { %v1590_v57 = vrot.slane %v1589_v61, 4  ;;  %v1632_v49 = vrot.slane %v1631_v10, 4 }
 0x239   : > { %v1611_v0 = vrot.slane %v1610_v26, 4  ;;  %v1653_v46 = vrot.slane %v1652_v63, 4  ;;  %v1681_v51 = vunpack.c.0.s8 %v1680_v1  ;;  %vm1704_vm0 = vcmp.lt.s32.totalorder %v2642_v60, 512 }
 0x23a   : > { %v1591_v38 = vadd.f32 %v1590_v57, %v1589_v61  ;;  %v1633_v44 = vadd.f32 %v1632_v49, %v1631_v10 }
 0x23b   : > { %v1612_v59 = vadd.f32 %v1611_v0, %v1610_v26  ;;  %v1654_v23 = vadd.f32 %v1653_v46, %v1652_v63  ;;  %v1684_v21 = vsub.s32 %v1681_v51, %v2641_v4 }
 0x23c   : > { %v1592_v2 = vrot.slane %v1591_v38, 2  ;;  %v1634_v40 = vrot.slane %v1633_v44, 2 }
 0x23d   : > { %v1613_v16 = vrot.slane %v1612_v59, 2  ;;  %v1655_v48 = vrot.slane %v1654_v23, 2 }
 0x23e   : > { %v1593_v33 = vadd.f32 %v1592_v2, %v1591_v38  ;;  %v1635_v43 = vadd.f32 %v1634_v40, %v1633_v44 }
 0x23f   : > { %v1614_v47 = vadd.f32 %v1613_v16, %v1612_v59  ;;  %v1656_v36 = vadd.f32 %v1655_v48, %v1654_v23 }
 0x240   : > { %v1594_v11 = vrot.slane %v1593_v33, 1  ;;  %v1636_v42 = vrot.slane %v1635_v43, 1 }
 0x241   : > { %v1615_v54 = vrot.slane %v1614_v47, 1  ;;  %v1657_v56 = vrot.slane %v1656_v36, 1 }
 0x242   : > { %v1595_v62 = vadd.f32 %v1594_v11, %v1593_v33  ;;  %v1637_v3 = vadd.f32 %v1636_v42, %v1635_v43 }
 0x243   : > { %v1616_v41 = vadd.f32 %v1615_v54, %v1614_v47  ;;  %v1658_v5 = vadd.f32 %v1657_v56, %v1656_v36 }
 0x244   : > { %v1669_v32 = vadd.f32 %v1668_v24, %v1595_v62  ;;  %v1671_v17 = vadd.f32 %v1668_v24, %v1637_v3 }
 0x245   : > { %v1670_v25 = vadd.f32 %v1668_v24, %v1616_v41  ;;  %v1672_v8 = vadd.f32 %v1668_v24, %v1658_v5 }
 0x247   : > { %v1677_v37 = vcombine.low %v1669_v32, %v1670_v25  ;;  %v1678_v22 = vcombine.low %v1671_v17, %v1672_v8 }
 0x249   : > { %v1685_v6 = vrot.slane %v1677_v37, %v1684_v21  ;;  %v1692_v27 = vrot.slane %v1678_v22, %v1684_v21 }
 0x24b   : > { %v1693_v39 = vcombine.low %v1685_v6, %v1692_v27 }
 0x24d   : > { %v1700_v58 = vrot.slane %v1693_v39, %v1684_v21 }
 0x24f   : > { %1706 = vst.msk [vmem:[%s280_s22] sm:$0xf] %vm1704_vm0, %v1700_v58 }
 0x250 PF: > { %s19_s26 = sadd.s32 1, %s1818_s26  }
 0x251   : > { %p16_p4 = scmp.ge.s32.totalorder %s19_s26, 4  }
 0x253   :  { %18 = sbr.rel (!%p16_p4) target bundleno = 3 (0x3), region = 78 }

</bundles_post_ra>
